<compile_context>
chip_gen: v5e
topology: v5e:2x2
jax: 0.10.0
libtpu: 0.0.40
codegen_flags: <defaults>
</compile_context>

<pallas_src>
import functools

import jax
import jax.numpy as jnp
import numpy as np
from jax.experimental import pallas as pl
from jax.experimental.pallas import tpu as pltpu


# ----------------- fused (embed + dual-GRU + alpha + output) kernel ------------------
def _fused_kernel(tok_ref, wslab_ref, eslab_ref, out_ref, *, B, T, H, VPAD):
    B2 = 2 * B          # raw rows then anon rows
    H2 = 2 * H
    GW = 3 * H          # gate width, gates stacked r|z|n along lanes
    OB = out_ref.shape[0]

    # ---- carve the two parameter slabs with static ref slices (one DMA per slab) ----
    r_whh = VPAD
    r_bhn = r_whh + H2
    r_h0 = r_bhn + B2
    r_blk = r_h0 + B2

    table = wslab_ref[0:VPAD, :]                               # (VPAD,3H) f32: emb@W_ih + x biases
    whh = wslab_ref[r_whh:r_whh + H2, :].astype(jnp.bfloat16)  # (2H,3H) bf16 recurrent weights
    bhn = wslab_ref[r_bhn:r_bhn + B2, :]                       # (2B,3H): b_hh_n at lanes [2H:3H)
    h = wslab_ref[r_h0:r_h0 + B2, 0:H]                         # (2B,H) initial hidden
    blkmask = wslab_ref[r_blk:r_blk + B2, 0:H2]                # (2B,2H) block-diagonal selector

    tl = tok_ref[...]                                          # (2B,T+1) int32
    tok = tl[:, 0:T]
    len_col = tl[:, T:T + 1]

    vocab_iota = jax.lax.broadcasted_iota(jnp.int32, (B2, VPAD), 1)

    # ---- fully unrolled serial recurrence: both encoders share every step ----
    for t in range(T):
        # x side: fused embedding + input projection + (b_ih + b_hh r/z) biases, done as
        # a one-hot MXU gather from the VMEM-resident table. Exact in f32 and independent
        # of the loop-carried h, so the scheduler overlaps it with the recurrent chain.
        onehot = (vocab_iota == tok[:, t:t + 1]).astype(jnp.float32)       # (2B,VPAD)
        xt = jnp.dot(onehot, table, preferred_element_type=jnp.float32)    # (2B,3H)

        # h side: one block matmul covers both encoders (bf16 operands, f32 accumulate).
        h2 = (jnp.concatenate([h, h], axis=-1) * blkmask).astype(jnp.bfloat16)
        hg = jnp.dot(h2, whh, preferred_element_type=jnp.float32) + bhn    # (2B,3H)

        # gates: one fused sigmoid over the contiguous r|z lane range [0:2H).
        rz = jax.nn.sigmoid(xt[:, 0:H2] + hg[:, 0:H2])
        r = rz[:, 0:H]
        z = rz[:, H:H2]
        n = jnp.tanh(xt[:, H2:GW] + r * hg[:, H2:GW])
        h_new = (1.0 - z) * n + z * h
        # pack_padded_sequence semantics: hidden stops updating past each row's length
        h = jnp.where(len_col > t, h_new, h)

    # ---- epilogue: learnable alpha gate + output projection (128-lane padded) ----
    w1r = eslab_ref[0:H, :]                 # (H,128) zero-padded beyond the true widths
    w1a = eslab_ref[H:H2, :]
    wo = eslab_ref[H2:GW, :]
    misc = eslab_ref[GW:GW + 8, :]          # rows: b1 | w2 | b2 | bo | 0...
    b1 = misc[0:1, :]
    w2 = misc[1:2, :]
    b2 = misc[2:3, 0:1]
    bo = misc[3:4, :]

    raw_h = h[0:B, :]
    anon_h = h[B:B2, :]
    hid = jnp.maximum(
        jnp.dot(raw_h, w1r, preferred_element_type=jnp.float32)
        + jnp.dot(anon_h, w1a, preferred_element_type=jnp.float32)
        + b1, 0.0)                                                          # (B,128)
    alpha = jax.nn.sigmoid(jnp.sum(hid * w2, axis=-1, keepdims=True) + b2)  # (B,1)
    weighted = raw_h * alpha + anon_h * (1.0 - alpha)                       # (B,H)
    res = jnp.dot(weighted, wo, preferred_element_type=jnp.float32) + bo    # (B,128)
    if OB > B:   # pad batch rows so the store is a full (8,128)-aligned unmasked vst
        res = jnp.concatenate(
            [res, jnp.zeros((OB - B, res.shape[1]), jnp.float32)], axis=0)
    out_ref[...] = res


@functools.partial(jax.jit, static_argnames=("out_dim", "hidden", "vpad"))
def raw_anon_forward(tok_raw, len_raw, tok_anon, len_anon, wslab, eslab,
                     *, out_dim, hidden, vpad):
    """Everything runs in one pallas_call; the only XLA glue is a tiny int32 slab."""
    B, T_raw = tok_raw.shape
    _, T_anon = tok_anon.shape
    T = max(T_raw, T_anon)
    OB = max(8, ((B + 7) // 8) * 8)

    # Combined token/length slab (~300 B of int32). Anon token ids are offset into the
    # second half of the fused lookup table; padded positions are masked by `lengths`.
    tr = jnp.pad(tok_raw.astype(jnp.int32), ((0, 0), (0, T - T_raw)))
    ta = jnp.pad(tok_anon.astype(jnp.int32), ((0, 0), (0, T - T_anon))) + (vpad // 2)
    lens = jnp.concatenate([len_raw, len_anon]).astype(jnp.int32)[:, None]     # (2B,1)
    toklen = jnp.concatenate([jnp.concatenate([tr, ta], axis=0), lens], axis=1)  # (2B,T+1)

    kernel = functools.partial(_fused_kernel, B=B, T=T, H=hidden, VPAD=vpad)
    vmem = pl.BlockSpec(memory_space=pltpu.MemorySpace.VMEM)
    out_pad = pl.pallas_call(
        kernel,
        out_shape=jax.ShapeDtypeStruct((OB, eslab.shape[1]), jnp.float32),
        in_specs=[vmem, vmem, vmem],
        out_specs=vmem,
        # Single invocation, no grid: <200 KB VMEM-resident, dependence-latency bound.
        # TODO(synk): for many independent (raw, anon) batches on v7x, add a leading
        # batch grid axis with dimension_semantics=("parallel",) to use the second TC.
    )(toklen, wslab, eslab)
    return out_pad[:B, :out_dim]


# -------------------------------- pure-JAX reference ---------------------------------
def gru_ref(emb, tokens, lengths, h0, w_ih, w_hh, b_ih, b_hh):
    x = jnp.take(emb, tokens, axis=0).astype(jnp.float32)
    T = x.shape[1]

    def step(h, inp):
        xt, t = inp
        r = jax.nn.sigmoid(xt @ w_ih[0] + b_ih[0] + h @ w_hh[0] + b_hh[0])
        z = jax.nn.sigmoid(xt @ w_ih[1] + b_ih[1] + h @ w_hh[1] + b_hh[1])
        n = jnp.tanh(xt @ w_ih[2] + b_ih[2] + r * (h @ w_hh[2] + b_hh[2]))
        h_new = (1.0 - z) * n + z * h
        h_new = jnp.where((t < lengths)[:, None], h_new, h)
        return h_new, None

    h, _ = jax.lax.scan(step, h0, (jnp.transpose(x, (1, 0, 2)), jnp.arange(T)))
    return h


def full_ref(emb_r, tok_r, len_r, h0_r, p_r, emb_a, tok_a, len_a, h0_a, p_a,
             w1r, w1a, b1, w2, b2, wo, bo):
    raw_h = gru_ref(emb_r, tok_r, len_r, h0_r, *p_r)
    anon_h = gru_ref(emb_a, tok_a, len_a, h0_a, *p_a)
    hid = jnp.maximum(raw_h @ w1r + anon_h @ w1a + b1, 0.0)
    alpha = jax.nn.sigmoid(jnp.sum(hid * w2, axis=-1, keepdims=True) + b2)
    weighted = raw_h * alpha + anon_h * (1.0 - alpha)
    return weighted @ wo + bo


# ---------------------------------------- main ----------------------------------------
if __name__ == "__main__":
    B, H, E, O = 4, 32, 32, 16
    V_raw, T_raw = 50, 8
    V_anon, T_anon = 40, 6
    VPAD = 128            # fused lookup table: raw vocab in rows [0,64), anon in [64,128)
    VOFF = VPAD // 2
    assert V_raw <= VOFF and VOFF + V_anon <= VPAD

    key = jax.random.PRNGKey(0)
    ks = jax.random.split(key, 24)

    def uni(k, shape, scale):
        return jax.random.uniform(k, shape, jnp.float32, -scale, scale)

    sH = 1.0 / np.sqrt(H)
    s2H = 1.0 / np.sqrt(2 * H)

    # raw encoder params (nn.Embedding + nn.GRU), per-gate layout (r, z, n)
    emb_raw = jax.random.normal(ks[0], (V_raw, E), jnp.float32)
    wih_raw = uni(ks[1], (3, E, H), sH)
    whh_raw = uni(ks[2], (3, H, H), sH)
    bih_raw = uni(ks[3], (3, 1, H), sH)
    bhh_raw = uni(ks[4], (3, 1, H), sH)
    h0_raw = jax.random.normal(ks[5], (B, H), jnp.float32) * np.sqrt(2.0 / (B * H + H))

    # anon encoder params
    emb_anon = jax.random.normal(ks[6], (V_anon, E), jnp.float32)
    wih_anon = uni(ks[7], (3, E, H), sH)
    whh_anon = uni(ks[8], (3, H, H), sH)
    bih_anon = uni(ks[9], (3, 1, H), sH)
    bhh_anon = uni(ks[10], (3, 1, H), sH)
    h0_anon = jax.random.normal(ks[11], (B, H), jnp.float32) * np.sqrt(2.0 / (B * H + H))

    # alpha_fc: Linear(2H, H) -> ReLU -> Linear(H, 1) -> Sigmoid
    w1_raw = uni(ks[12], (H, H), s2H)
    w1_anon = uni(ks[13], (H, H), s2H)
    b1 = uni(ks[14], (1, H), s2H)
    w2 = uni(ks[15], (1, H), sH)
    b2 = uni(ks[16], (1, 1), sH)

    # RawAnonProgramEncoder.output_fc: Linear(H, O)
    wo = uni(ks[17], (H, O), sH)
    bo = uni(ks[18], (1, O), sH)

    # inputs (lengths >= 1, as pack_padded_sequence requires)
    tok_raw = jax.random.randint(ks[19], (B, T_raw), 0, V_raw, jnp.int32)
    len_raw = jax.random.randint(ks[20], (B,), 1, T_raw + 1, jnp.int32)
    tok_anon = jax.random.randint(ks[21], (B, T_anon), 0, V_anon, jnp.int32)
    len_anon = jax.random.randint(ks[22], (B,), 1, T_anon + 1, jnp.int32)

    # ---- pre-pack parameters into two VMEM slabs (done ONCE, outside the hot path) ----
    def stack_gates(w):            # (3, A, H) -> (A, 3H), gates r|z|n along lanes
        return jnp.concatenate([w[0], w[1], w[2]], axis=-1)

    def x_bias(bih, bhh):          # fold b_hh into r,z; keep n's hh bias separate
        return jnp.concatenate([bih[0] + bhh[0], bih[1] + bhh[1], bih[2]], axis=-1)

    # Fused embedding->x-projection lookup tables (embedding, W_ih and x-side biases all
    # folded into one (V, 3H) row per token id).
    table_raw = emb_raw @ stack_gates(wih_raw) + x_bias(bih_raw, bhh_raw)     # (V_raw, 3H)
    table_anon = emb_anon @ stack_gates(wih_anon) + x_bias(bih_anon, bhh_anon)
    table_blk = jnp.zeros((VPAD, 3 * H), jnp.float32)
    table_blk = table_blk.at[:V_raw].set(table_raw)
    table_blk = table_blk.at[VOFF:VOFF + V_anon].set(table_anon)

    whh_blk = jnp.concatenate([stack_gates(whh_raw), stack_gates(whh_anon)], axis=0)  # (2H,3H)
    bhn_pad = jnp.zeros((2 * B, 3 * H), jnp.float32)
    bhn_pad = bhn_pad.at[:B, 2 * H:].set(jnp.tile(bhh_raw[2], (B, 1)))
    bhn_pad = bhn_pad.at[B:, 2 * H:].set(jnp.tile(bhh_anon[2], (B, 1)))
    h0_rows = jnp.zeros((2 * B, 3 * H), jnp.float32)
    h0_rows = h0_rows.at[:, :H].set(jnp.concatenate([h0_raw, h0_anon], axis=0))
    blk_rows = jnp.zeros((2 * B, 3 * H), jnp.float32)
    blk_rows = blk_rows.at[:B, :H].set(1.0)
    blk_rows = blk_rows.at[B:, H:2 * H].set(1.0)
    # recurrence slab: table | W_hh | b_hh_n | h0 | block mask  -> (216, 96) f32
    wslab = jnp.concatenate([table_blk, whh_blk, bhn_pad, h0_rows, blk_rows], axis=0)

    def pad_lanes(x, width=128):
        return jnp.pad(x, ((0, 0), (0, width - x.shape[1])))

    misc = jnp.zeros((8, 128), jnp.float32)
    misc = misc.at[0, :H].set(b1[0])
    misc = misc.at[1, :H].set(w2[0])
    misc = misc.at[2, 0].set(b2[0, 0])
    misc = misc.at[3, :O].set(bo[0])
    # epilogue slab: w1_raw | w1_anon | wo | misc  -> (104, 128) f32
    eslab = jnp.concatenate(
        [pad_lanes(w1_raw), pad_lanes(w1_anon), pad_lanes(wo), misc], axis=0)

    # ---- Pallas forward ----
    out = raw_anon_forward(tok_raw, len_raw, tok_anon, len_anon, wslab, eslab,
                           out_dim=O, hidden=H, vpad=VPAD)
    out = jax.block_until_ready(out)

    # ---- pure-JAX f32 reference check ----
    ref = full_ref(emb_raw, tok_raw, len_raw, h0_raw,
                   (wih_raw, whh_raw, bih_raw, bhh_raw),
                   emb_anon, tok_anon, len_anon, h0_anon,
                   (wih_anon, whh_anon, bih_anon, bhh_anon),
                   w1_raw, w1_anon, b1, w2, b2, wo, bo)
    ref = jax.block_until_ready(ref)
    # Tolerance loosened from 1e-4: the recurrent matmul now uses bf16 operands
    # (f32 accumulation, f32 gate math) per the performance review; the reference is f32.
    np.testing.assert_allclose(np.asarray(out), np.asarray(ref), rtol=3e-2, atol=3e-2)

    print("KERNEL_OK")
</pallas_src>

<mosaic_0001>
module attributes {stable_mosaic.version = 11 : i64} {
  func.func @_fused_kernel(%arg0: memref<8x9xi32, #tpu.memory_space<vmem>>, %arg1: memref<216x96xf32, #tpu.memory_space<vmem>>, %arg2: memref<104x128xf32, #tpu.memory_space<vmem>>, %arg3: memref<8x128xf32, #tpu.memory_space<vmem>>) attributes {dimension_semantics = [], scalar_prefetch = 0 : i64, scratch_operands = 0 : i64, tpu.core_type = #tpu.core_type<tc>} {
    %c0 = arith.constant 0 : index
    %c0_0 = arith.constant 0 : index
    %0 = vector.load %arg1[%c0, %c0_0] : memref<216x96xf32, #tpu.memory_space<vmem>>, vector<128x96xf32>
    %c128 = arith.constant 128 : index
    %c0_1 = arith.constant 0 : index
    %1 = vector.load %arg1[%c128, %c0_1] : memref<216x96xf32, #tpu.memory_space<vmem>>, vector<64x96xf32>
    %2 = arith.truncf %1 : vector<64x96xf32> to vector<64x96xbf16>
    %c192 = arith.constant 192 : index
    %c0_2 = arith.constant 0 : index
    %3 = vector.load %arg1[%c192, %c0_2] : memref<216x96xf32, #tpu.memory_space<vmem>>, vector<8x96xf32>
    %c200 = arith.constant 200 : index
    %c0_3 = arith.constant 0 : index
    %4 = vector.load %arg1[%c200, %c0_3] : memref<216x96xf32, #tpu.memory_space<vmem>>, vector<8x32xf32>
    %c208 = arith.constant 208 : index
    %c0_4 = arith.constant 0 : index
    %5 = vector.load %arg1[%c208, %c0_4] : memref<216x96xf32, #tpu.memory_space<vmem>>, vector<8x64xf32>
    %c0_5 = arith.constant 0 : index
    %c0_6 = arith.constant 0 : index
    %6 = vector.load %arg0[%c0_5, %c0_6] : memref<8x9xi32, #tpu.memory_space<vmem>>, vector<8x9xi32>
    %7 = vector.extract_strided_slice %6 {offsets = [0, 0], sizes = [8, 8], strides = [1, 1]} : vector<8x9xi32> to vector<8x8xi32>
    %8 = vector.extract_strided_slice %6 {offsets = [0, 8], sizes = [8, 1], strides = [1, 1]} : vector<8x9xi32> to vector<8x1xi32>
    %9 = tpu.iota {dimensions = array<i32: 1>} : vector<8x128xi32>
    %10 = vector.extract_strided_slice %7 {offsets = [0, 0], sizes = [8, 1], strides = [1, 1]} : vector<8x8xi32> to vector<8x1xi32>
    %11 = vector.broadcast %10 : vector<8x1xi32> to vector<8x128xi32>
    %12 = arith.cmpi eq, %9, %11 : vector<8x128xi32>
    %13 = arith.extui %12 : vector<8x128xi1> to vector<8x128xi32>
    %14 = arith.sitofp %13 : vector<8x128xi32> to vector<8x128xf32>
    %cst = arith.constant dense<0.000000e+00> : vector<8x96xf32>
    %15 = tpu.matmul %14, %0, %cst {dimension_numbers = #tpu.dot_dimension_numbers<[1], [0], [0], [1], [0, 0, 1, 1], [], []>} : vector<8x128xf32>, vector<128x96xf32>, vector<8x96xf32> -> vector<8x96xf32>
    %16 = tpu.concatenate %4, %4 in 1 : vector<8x32xf32>, vector<8x32xf32> -> vector<8x64xf32>
    %17 = arith.mulf %16, %5 : vector<8x64xf32>
    %18 = arith.truncf %17 : vector<8x64xf32> to vector<8x64xbf16>
    %cst_7 = arith.constant dense<0.000000e+00> : vector<8x96xf32>
    %19 = tpu.matmul %18, %2, %cst_7 {dimension_numbers = #tpu.dot_dimension_numbers<[1], [0], [0], [1], [0, 0, 1, 1], [], []>} : vector<8x64xbf16>, vector<64x96xbf16>, vector<8x96xf32> -> vector<8x96xf32>
    %20 = arith.addf %19, %3 : vector<8x96xf32>
    %21 = vector.extract_strided_slice %15 {offsets = [0, 0], sizes = [8, 64], strides = [1, 1]} : vector<8x96xf32> to vector<8x64xf32>
    %22 = vector.extract_strided_slice %20 {offsets = [0, 0], sizes = [8, 64], strides = [1, 1]} : vector<8x96xf32> to vector<8x64xf32>
    %23 = arith.addf %21, %22 : vector<8x64xf32>
    %24 = arith.negf %23 : vector<8x64xf32>
    %25 = math.exp %24 : vector<8x64xf32>
    %cst_8 = arith.constant 1.000000e+00 : f32
    %26 = vector.broadcast %cst_8 : f32 to vector<8x64xf32>
    %27 = arith.addf %26, %25 : vector<8x64xf32>
    %28 = arith.divf %26, %27 : vector<8x64xf32>
    %29 = vector.extract_strided_slice %28 {offsets = [0, 0], sizes = [8, 32], strides = [1, 1]} : vector<8x64xf32> to vector<8x32xf32>
    %30 = vector.extract_strided_slice %28 {offsets = [0, 32], sizes = [8, 32], strides = [1, 1]} : vector<8x64xf32> to vector<8x32xf32>
    %31 = vector.extract_strided_slice %15 {offsets = [0, 64], sizes = [8, 32], strides = [1, 1]} : vector<8x96xf32> to vector<8x32xf32>
    %32 = vector.extract_strided_slice %20 {offsets = [0, 64], sizes = [8, 32], strides = [1, 1]} : vector<8x96xf32> to vector<8x32xf32>
    %33 = arith.mulf %29, %32 : vector<8x32xf32>
    %34 = arith.addf %31, %33 : vector<8x32xf32>
    %35 = math.tanh %34 : vector<8x32xf32>
    %cst_9 = arith.constant 1.000000e+00 : f32
    %36 = vector.broadcast %cst_9 : f32 to vector<8x32xf32>
    %37 = arith.subf %36, %30 : vector<8x32xf32>
    %38 = arith.mulf %37, %35 : vector<8x32xf32>
    %39 = arith.mulf %30, %4 : vector<8x32xf32>
    %40 = arith.addf %38, %39 : vector<8x32xf32>
    %c0_i32 = arith.constant 0 : i32
    %41 = vector.broadcast %c0_i32 : i32 to vector<8x1xi32>
    %42 = arith.cmpi sgt, %8, %41 : vector<8x1xi32>
    %43 = vector.shape_cast %42 : vector<8x1xi1> to vector<8x1xi1>
    %44 = vector.broadcast %43 : vector<8x1xi1> to vector<8x32xi1>
    %45 = arith.select %44, %40, %4 : vector<8x32xi1>, vector<8x32xf32>
    %46 = vector.extract_strided_slice %7 {offsets = [0, 1], sizes = [8, 1], strides = [1, 1]} : vector<8x8xi32> to vector<8x1xi32>
    %47 = vector.broadcast %46 : vector<8x1xi32> to vector<8x128xi32>
    %48 = arith.cmpi eq, %9, %47 : vector<8x128xi32>
    %49 = arith.extui %48 : vector<8x128xi1> to vector<8x128xi32>
    %50 = arith.sitofp %49 : vector<8x128xi32> to vector<8x128xf32>
    %cst_10 = arith.constant dense<0.000000e+00> : vector<8x96xf32>
    %51 = tpu.matmul %50, %0, %cst_10 {dimension_numbers = #tpu.dot_dimension_numbers<[1], [0], [0], [1], [0, 0, 1, 1], [], []>} : vector<8x128xf32>, vector<128x96xf32>, vector<8x96xf32> -> vector<8x96xf32>
    %52 = tpu.concatenate %45, %45 in 1 : vector<8x32xf32>, vector<8x32xf32> -> vector<8x64xf32>
    %53 = arith.mulf %52, %5 : vector<8x64xf32>
    %54 = arith.truncf %53 : vector<8x64xf32> to vector<8x64xbf16>
    %cst_11 = arith.constant dense<0.000000e+00> : vector<8x96xf32>
    %55 = tpu.matmul %54, %2, %cst_11 {dimension_numbers = #tpu.dot_dimension_numbers<[1], [0], [0], [1], [0, 0, 1, 1], [], []>} : vector<8x64xbf16>, vector<64x96xbf16>, vector<8x96xf32> -> vector<8x96xf32>
    %56 = arith.addf %55, %3 : vector<8x96xf32>
    %57 = vector.extract_strided_slice %51 {offsets = [0, 0], sizes = [8, 64], strides = [1, 1]} : vector<8x96xf32> to vector<8x64xf32>
    %58 = vector.extract_strided_slice %56 {offsets = [0, 0], sizes = [8, 64], strides = [1, 1]} : vector<8x96xf32> to vector<8x64xf32>
    %59 = arith.addf %57, %58 : vector<8x64xf32>
    %60 = arith.negf %59 : vector<8x64xf32>
    %61 = math.exp %60 : vector<8x64xf32>
    %cst_12 = arith.constant 1.000000e+00 : f32
    %62 = vector.broadcast %cst_12 : f32 to vector<8x64xf32>
    %63 = arith.addf %62, %61 : vector<8x64xf32>
    %64 = arith.divf %62, %63 : vector<8x64xf32>
    %65 = vector.extract_strided_slice %64 {offsets = [0, 0], sizes = [8, 32], strides = [1, 1]} : vector<8x64xf32> to vector<8x32xf32>
    %66 = vector.extract_strided_slice %64 {offsets = [0, 32], sizes = [8, 32], strides = [1, 1]} : vector<8x64xf32> to vector<8x32xf32>
    %67 = vector.extract_strided_slice %51 {offsets = [0, 64], sizes = [8, 32], strides = [1, 1]} : vector<8x96xf32> to vector<8x32xf32>
    %68 = vector.extract_strided_slice %56 {offsets = [0, 64], sizes = [8, 32], strides = [1, 1]} : vector<8x96xf32> to vector<8x32xf32>
    %69 = arith.mulf %65, %68 : vector<8x32xf32>
    %70 = arith.addf %67, %69 : vector<8x32xf32>
    %71 = math.tanh %70 : vector<8x32xf32>
    %cst_13 = arith.constant 1.000000e+00 : f32
    %72 = vector.broadcast %cst_13 : f32 to vector<8x32xf32>
    %73 = arith.subf %72, %66 : vector<8x32xf32>
    %74 = arith.mulf %73, %71 : vector<8x32xf32>
    %75 = arith.mulf %66, %45 : vector<8x32xf32>
    %76 = arith.addf %74, %75 : vector<8x32xf32>
    %c1_i32 = arith.constant 1 : i32
    %77 = vector.broadcast %c1_i32 : i32 to vector<8x1xi32>
    %78 = arith.cmpi sgt, %8, %77 : vector<8x1xi32>
    %79 = vector.shape_cast %78 : vector<8x1xi1> to vector<8x1xi1>
    %80 = vector.broadcast %79 : vector<8x1xi1> to vector<8x32xi1>
    %81 = arith.select %80, %76, %45 : vector<8x32xi1>, vector<8x32xf32>
    %82 = vector.extract_strided_slice %7 {offsets = [0, 2], sizes = [8, 1], strides = [1, 1]} : vector<8x8xi32> to vector<8x1xi32>
    %83 = vector.broadcast %82 : vector<8x1xi32> to vector<8x128xi32>
    %84 = arith.cmpi eq, %9, %83 : vector<8x128xi32>
    %85 = arith.extui %84 : vector<8x128xi1> to vector<8x128xi32>
    %86 = arith.sitofp %85 : vector<8x128xi32> to vector<8x128xf32>
    %cst_14 = arith.constant dense<0.000000e+00> : vector<8x96xf32>
    %87 = tpu.matmul %86, %0, %cst_14 {dimension_numbers = #tpu.dot_dimension_numbers<[1], [0], [0], [1], [0, 0, 1, 1], [], []>} : vector<8x128xf32>, vector<128x96xf32>, vector<8x96xf32> -> vector<8x96xf32>
    %88 = tpu.concatenate %81, %81 in 1 : vector<8x32xf32>, vector<8x32xf32> -> vector<8x64xf32>
    %89 = arith.mulf %88, %5 : vector<8x64xf32>
    %90 = arith.truncf %89 : vector<8x64xf32> to vector<8x64xbf16>
    %cst_15 = arith.constant dense<0.000000e+00> : vector<8x96xf32>
    %91 = tpu.matmul %90, %2, %cst_15 {dimension_numbers = #tpu.dot_dimension_numbers<[1], [0], [0], [1], [0, 0, 1, 1], [], []>} : vector<8x64xbf16>, vector<64x96xbf16>, vector<8x96xf32> -> vector<8x96xf32>
    %92 = arith.addf %91, %3 : vector<8x96xf32>
    %93 = vector.extract_strided_slice %87 {offsets = [0, 0], sizes = [8, 64], strides = [1, 1]} : vector<8x96xf32> to vector<8x64xf32>
    %94 = vector.extract_strided_slice %92 {offsets = [0, 0], sizes = [8, 64], strides = [1, 1]} : vector<8x96xf32> to vector<8x64xf32>
    %95 = arith.addf %93, %94 : vector<8x64xf32>
    %96 = arith.negf %95 : vector<8x64xf32>
    %97 = math.exp %96 : vector<8x64xf32>
    %cst_16 = arith.constant 1.000000e+00 : f32
    %98 = vector.broadcast %cst_16 : f32 to vector<8x64xf32>
    %99 = arith.addf %98, %97 : vector<8x64xf32>
    %100 = arith.divf %98, %99 : vector<8x64xf32>
    %101 = vector.extract_strided_slice %100 {offsets = [0, 0], sizes = [8, 32], strides = [1, 1]} : vector<8x64xf32> to vector<8x32xf32>
    %102 = vector.extract_strided_slice %100 {offsets = [0, 32], sizes = [8, 32], strides = [1, 1]} : vector<8x64xf32> to vector<8x32xf32>
    %103 = vector.extract_strided_slice %87 {offsets = [0, 64], sizes = [8, 32], strides = [1, 1]} : vector<8x96xf32> to vector<8x32xf32>
    %104 = vector.extract_strided_slice %92 {offsets = [0, 64], sizes = [8, 32], strides = [1, 1]} : vector<8x96xf32> to vector<8x32xf32>
    %105 = arith.mulf %101, %104 : vector<8x32xf32>
    %106 = arith.addf %103, %105 : vector<8x32xf32>
    %107 = math.tanh %106 : vector<8x32xf32>
    %cst_17 = arith.constant 1.000000e+00 : f32
    %108 = vector.broadcast %cst_17 : f32 to vector<8x32xf32>
    %109 = arith.subf %108, %102 : vector<8x32xf32>
    %110 = arith.mulf %109, %107 : vector<8x32xf32>
    %111 = arith.mulf %102, %81 : vector<8x32xf32>
    %112 = arith.addf %110, %111 : vector<8x32xf32>
    %c2_i32 = arith.constant 2 : i32
    %113 = vector.broadcast %c2_i32 : i32 to vector<8x1xi32>
    %114 = arith.cmpi sgt, %8, %113 : vector<8x1xi32>
    %115 = vector.shape_cast %114 : vector<8x1xi1> to vector<8x1xi1>
    %116 = vector.broadcast %115 : vector<8x1xi1> to vector<8x32xi1>
    %117 = arith.select %116, %112, %81 : vector<8x32xi1>, vector<8x32xf32>
    %118 = vector.extract_strided_slice %7 {offsets = [0, 3], sizes = [8, 1], strides = [1, 1]} : vector<8x8xi32> to vector<8x1xi32>
    %119 = vector.broadcast %118 : vector<8x1xi32> to vector<8x128xi32>
    %120 = arith.cmpi eq, %9, %119 : vector<8x128xi32>
    %121 = arith.extui %120 : vector<8x128xi1> to vector<8x128xi32>
    %122 = arith.sitofp %121 : vector<8x128xi32> to vector<8x128xf32>
    %cst_18 = arith.constant dense<0.000000e+00> : vector<8x96xf32>
    %123 = tpu.matmul %122, %0, %cst_18 {dimension_numbers = #tpu.dot_dimension_numbers<[1], [0], [0], [1], [0, 0, 1, 1], [], []>} : vector<8x128xf32>, vector<128x96xf32>, vector<8x96xf32> -> vector<8x96xf32>
    %124 = tpu.concatenate %117, %117 in 1 : vector<8x32xf32>, vector<8x32xf32> -> vector<8x64xf32>
    %125 = arith.mulf %124, %5 : vector<8x64xf32>
    %126 = arith.truncf %125 : vector<8x64xf32> to vector<8x64xbf16>
    %cst_19 = arith.constant dense<0.000000e+00> : vector<8x96xf32>
    %127 = tpu.matmul %126, %2, %cst_19 {dimension_numbers = #tpu.dot_dimension_numbers<[1], [0], [0], [1], [0, 0, 1, 1], [], []>} : vector<8x64xbf16>, vector<64x96xbf16>, vector<8x96xf32> -> vector<8x96xf32>
    %128 = arith.addf %127, %3 : vector<8x96xf32>
    %129 = vector.extract_strided_slice %123 {offsets = [0, 0], sizes = [8, 64], strides = [1, 1]} : vector<8x96xf32> to vector<8x64xf32>
    %130 = vector.extract_strided_slice %128 {offsets = [0, 0], sizes = [8, 64], strides = [1, 1]} : vector<8x96xf32> to vector<8x64xf32>
    %131 = arith.addf %129, %130 : vector<8x64xf32>
    %132 = arith.negf %131 : vector<8x64xf32>
    %133 = math.exp %132 : vector<8x64xf32>
    %cst_20 = arith.constant 1.000000e+00 : f32
    %134 = vector.broadcast %cst_20 : f32 to vector<8x64xf32>
    %135 = arith.addf %134, %133 : vector<8x64xf32>
    %136 = arith.divf %134, %135 : vector<8x64xf32>
    %137 = vector.extract_strided_slice %136 {offsets = [0, 0], sizes = [8, 32], strides = [1, 1]} : vector<8x64xf32> to vector<8x32xf32>
    %138 = vector.extract_strided_slice %136 {offsets = [0, 32], sizes = [8, 32], strides = [1, 1]} : vector<8x64xf32> to vector<8x32xf32>
    %139 = vector.extract_strided_slice %123 {offsets = [0, 64], sizes = [8, 32], strides = [1, 1]} : vector<8x96xf32> to vector<8x32xf32>
    %140 = vector.extract_strided_slice %128 {offsets = [0, 64], sizes = [8, 32], strides = [1, 1]} : vector<8x96xf32> to vector<8x32xf32>
    %141 = arith.mulf %137, %140 : vector<8x32xf32>
    %142 = arith.addf %139, %141 : vector<8x32xf32>
    %143 = math.tanh %142 : vector<8x32xf32>
    %cst_21 = arith.constant 1.000000e+00 : f32
    %144 = vector.broadcast %cst_21 : f32 to vector<8x32xf32>
    %145 = arith.subf %144, %138 : vector<8x32xf32>
    %146 = arith.mulf %145, %143 : vector<8x32xf32>
    %147 = arith.mulf %138, %117 : vector<8x32xf32>
    %148 = arith.addf %146, %147 : vector<8x32xf32>
    %c3_i32 = arith.constant 3 : i32
    %149 = vector.broadcast %c3_i32 : i32 to vector<8x1xi32>
    %150 = arith.cmpi sgt, %8, %149 : vector<8x1xi32>
    %151 = vector.shape_cast %150 : vector<8x1xi1> to vector<8x1xi1>
    %152 = vector.broadcast %151 : vector<8x1xi1> to vector<8x32xi1>
    %153 = arith.select %152, %148, %117 : vector<8x32xi1>, vector<8x32xf32>
    %154 = vector.extract_strided_slice %7 {offsets = [0, 4], sizes = [8, 1], strides = [1, 1]} : vector<8x8xi32> to vector<8x1xi32>
    %155 = vector.broadcast %154 : vector<8x1xi32> to vector<8x128xi32>
    %156 = arith.cmpi eq, %9, %155 : vector<8x128xi32>
    %157 = arith.extui %156 : vector<8x128xi1> to vector<8x128xi32>
    %158 = arith.sitofp %157 : vector<8x128xi32> to vector<8x128xf32>
    %cst_22 = arith.constant dense<0.000000e+00> : vector<8x96xf32>
    %159 = tpu.matmul %158, %0, %cst_22 {dimension_numbers = #tpu.dot_dimension_numbers<[1], [0], [0], [1], [0, 0, 1, 1], [], []>} : vector<8x128xf32>, vector<128x96xf32>, vector<8x96xf32> -> vector<8x96xf32>
    %160 = tpu.concatenate %153, %153 in 1 : vector<8x32xf32>, vector<8x32xf32> -> vector<8x64xf32>
    %161 = arith.mulf %160, %5 : vector<8x64xf32>
    %162 = arith.truncf %161 : vector<8x64xf32> to vector<8x64xbf16>
    %cst_23 = arith.constant dense<0.000000e+00> : vector<8x96xf32>
    %163 = tpu.matmul %162, %2, %cst_23 {dimension_numbers = #tpu.dot_dimension_numbers<[1], [0], [0], [1], [0, 0, 1, 1], [], []>} : vector<8x64xbf16>, vector<64x96xbf16>, vector<8x96xf32> -> vector<8x96xf32>
    %164 = arith.addf %163, %3 : vector<8x96xf32>
    %165 = vector.extract_strided_slice %159 {offsets = [0, 0], sizes = [8, 64], strides = [1, 1]} : vector<8x96xf32> to vector<8x64xf32>
    %166 = vector.extract_strided_slice %164 {offsets = [0, 0], sizes = [8, 64], strides = [1, 1]} : vector<8x96xf32> to vector<8x64xf32>
    %167 = arith.addf %165, %166 : vector<8x64xf32>
    %168 = arith.negf %167 : vector<8x64xf32>
    %169 = math.exp %168 : vector<8x64xf32>
    %cst_24 = arith.constant 1.000000e+00 : f32
    %170 = vector.broadcast %cst_24 : f32 to vector<8x64xf32>
    %171 = arith.addf %170, %169 : vector<8x64xf32>
    %172 = arith.divf %170, %171 : vector<8x64xf32>
    %173 = vector.extract_strided_slice %172 {offsets = [0, 0], sizes = [8, 32], strides = [1, 1]} : vector<8x64xf32> to vector<8x32xf32>
    %174 = vector.extract_strided_slice %172 {offsets = [0, 32], sizes = [8, 32], strides = [1, 1]} : vector<8x64xf32> to vector<8x32xf32>
    %175 = vector.extract_strided_slice %159 {offsets = [0, 64], sizes = [8, 32], strides = [1, 1]} : vector<8x96xf32> to vector<8x32xf32>
    %176 = vector.extract_strided_slice %164 {offsets = [0, 64], sizes = [8, 32], strides = [1, 1]} : vector<8x96xf32> to vector<8x32xf32>
    %177 = arith.mulf %173, %176 : vector<8x32xf32>
    %178 = arith.addf %175, %177 : vector<8x32xf32>
    %179 = math.tanh %178 : vector<8x32xf32>
    %cst_25 = arith.constant 1.000000e+00 : f32
    %180 = vector.broadcast %cst_25 : f32 to vector<8x32xf32>
    %181 = arith.subf %180, %174 : vector<8x32xf32>
    %182 = arith.mulf %181, %179 : vector<8x32xf32>
    %183 = arith.mulf %174, %153 : vector<8x32xf32>
    %184 = arith.addf %182, %183 : vector<8x32xf32>
    %c4_i32 = arith.constant 4 : i32
    %185 = vector.broadcast %c4_i32 : i32 to vector<8x1xi32>
    %186 = arith.cmpi sgt, %8, %185 : vector<8x1xi32>
    %187 = vector.shape_cast %186 : vector<8x1xi1> to vector<8x1xi1>
    %188 = vector.broadcast %187 : vector<8x1xi1> to vector<8x32xi1>
    %189 = arith.select %188, %184, %153 : vector<8x32xi1>, vector<8x32xf32>
    %190 = vector.extract_strided_slice %7 {offsets = [0, 5], sizes = [8, 1], strides = [1, 1]} : vector<8x8xi32> to vector<8x1xi32>
    %191 = vector.broadcast %190 : vector<8x1xi32> to vector<8x128xi32>
    %192 = arith.cmpi eq, %9, %191 : vector<8x128xi32>
    %193 = arith.extui %192 : vector<8x128xi1> to vector<8x128xi32>
    %194 = arith.sitofp %193 : vector<8x128xi32> to vector<8x128xf32>
    %cst_26 = arith.constant dense<0.000000e+00> : vector<8x96xf32>
    %195 = tpu.matmul %194, %0, %cst_26 {dimension_numbers = #tpu.dot_dimension_numbers<[1], [0], [0], [1], [0, 0, 1, 1], [], []>} : vector<8x128xf32>, vector<128x96xf32>, vector<8x96xf32> -> vector<8x96xf32>
    %196 = tpu.concatenate %189, %189 in 1 : vector<8x32xf32>, vector<8x32xf32> -> vector<8x64xf32>
    %197 = arith.mulf %196, %5 : vector<8x64xf32>
    %198 = arith.truncf %197 : vector<8x64xf32> to vector<8x64xbf16>
    %cst_27 = arith.constant dense<0.000000e+00> : vector<8x96xf32>
    %199 = tpu.matmul %198, %2, %cst_27 {dimension_numbers = #tpu.dot_dimension_numbers<[1], [0], [0], [1], [0, 0, 1, 1], [], []>} : vector<8x64xbf16>, vector<64x96xbf16>, vector<8x96xf32> -> vector<8x96xf32>
    %200 = arith.addf %199, %3 : vector<8x96xf32>
    %201 = vector.extract_strided_slice %195 {offsets = [0, 0], sizes = [8, 64], strides = [1, 1]} : vector<8x96xf32> to vector<8x64xf32>
    %202 = vector.extract_strided_slice %200 {offsets = [0, 0], sizes = [8, 64], strides = [1, 1]} : vector<8x96xf32> to vector<8x64xf32>
    %203 = arith.addf %201, %202 : vector<8x64xf32>
    %204 = arith.negf %203 : vector<8x64xf32>
    %205 = math.exp %204 : vector<8x64xf32>
    %cst_28 = arith.constant 1.000000e+00 : f32
    %206 = vector.broadcast %cst_28 : f32 to vector<8x64xf32>
    %207 = arith.addf %206, %205 : vector<8x64xf32>
    %208 = arith.divf %206, %207 : vector<8x64xf32>
    %209 = vector.extract_strided_slice %208 {offsets = [0, 0], sizes = [8, 32], strides = [1, 1]} : vector<8x64xf32> to vector<8x32xf32>
    %210 = vector.extract_strided_slice %208 {offsets = [0, 32], sizes = [8, 32], strides = [1, 1]} : vector<8x64xf32> to vector<8x32xf32>
    %211 = vector.extract_strided_slice %195 {offsets = [0, 64], sizes = [8, 32], strides = [1, 1]} : vector<8x96xf32> to vector<8x32xf32>
    %212 = vector.extract_strided_slice %200 {offsets = [0, 64], sizes = [8, 32], strides = [1, 1]} : vector<8x96xf32> to vector<8x32xf32>
    %213 = arith.mulf %209, %212 : vector<8x32xf32>
    %214 = arith.addf %211, %213 : vector<8x32xf32>
    %215 = math.tanh %214 : vector<8x32xf32>
    %cst_29 = arith.constant 1.000000e+00 : f32
    %216 = vector.broadcast %cst_29 : f32 to vector<8x32xf32>
    %217 = arith.subf %216, %210 : vector<8x32xf32>
    %218 = arith.mulf %217, %215 : vector<8x32xf32>
    %219 = arith.mulf %210, %189 : vector<8x32xf32>
    %220 = arith.addf %218, %219 : vector<8x32xf32>
    %c5_i32 = arith.constant 5 : i32
    %221 = vector.broadcast %c5_i32 : i32 to vector<8x1xi32>
    %222 = arith.cmpi sgt, %8, %221 : vector<8x1xi32>
    %223 = vector.shape_cast %222 : vector<8x1xi1> to vector<8x1xi1>
    %224 = vector.broadcast %223 : vector<8x1xi1> to vector<8x32xi1>
    %225 = arith.select %224, %220, %189 : vector<8x32xi1>, vector<8x32xf32>
    %226 = vector.extract_strided_slice %7 {offsets = [0, 6], sizes = [8, 1], strides = [1, 1]} : vector<8x8xi32> to vector<8x1xi32>
    %227 = vector.broadcast %226 : vector<8x1xi32> to vector<8x128xi32>
    %228 = arith.cmpi eq, %9, %227 : vector<8x128xi32>
    %229 = arith.extui %228 : vector<8x128xi1> to vector<8x128xi32>
    %230 = arith.sitofp %229 : vector<8x128xi32> to vector<8x128xf32>
    %cst_30 = arith.constant dense<0.000000e+00> : vector<8x96xf32>
    %231 = tpu.matmul %230, %0, %cst_30 {dimension_numbers = #tpu.dot_dimension_numbers<[1], [0], [0], [1], [0, 0, 1, 1], [], []>} : vector<8x128xf32>, vector<128x96xf32>, vector<8x96xf32> -> vector<8x96xf32>
    %232 = tpu.concatenate %225, %225 in 1 : vector<8x32xf32>, vector<8x32xf32> -> vector<8x64xf32>
    %233 = arith.mulf %232, %5 : vector<8x64xf32>
    %234 = arith.truncf %233 : vector<8x64xf32> to vector<8x64xbf16>
    %cst_31 = arith.constant dense<0.000000e+00> : vector<8x96xf32>
    %235 = tpu.matmul %234, %2, %cst_31 {dimension_numbers = #tpu.dot_dimension_numbers<[1], [0], [0], [1], [0, 0, 1, 1], [], []>} : vector<8x64xbf16>, vector<64x96xbf16>, vector<8x96xf32> -> vector<8x96xf32>
    %236 = arith.addf %235, %3 : vector<8x96xf32>
    %237 = vector.extract_strided_slice %231 {offsets = [0, 0], sizes = [8, 64], strides = [1, 1]} : vector<8x96xf32> to vector<8x64xf32>
    %238 = vector.extract_strided_slice %236 {offsets = [0, 0], sizes = [8, 64], strides = [1, 1]} : vector<8x96xf32> to vector<8x64xf32>
    %239 = arith.addf %237, %238 : vector<8x64xf32>
    %240 = arith.negf %239 : vector<8x64xf32>
    %241 = math.exp %240 : vector<8x64xf32>
    %cst_32 = arith.constant 1.000000e+00 : f32
    %242 = vector.broadcast %cst_32 : f32 to vector<8x64xf32>
    %243 = arith.addf %242, %241 : vector<8x64xf32>
    %244 = arith.divf %242, %243 : vector<8x64xf32>
    %245 = vector.extract_strided_slice %244 {offsets = [0, 0], sizes = [8, 32], strides = [1, 1]} : vector<8x64xf32> to vector<8x32xf32>
    %246 = vector.extract_strided_slice %244 {offsets = [0, 32], sizes = [8, 32], strides = [1, 1]} : vector<8x64xf32> to vector<8x32xf32>
    %247 = vector.extract_strided_slice %231 {offsets = [0, 64], sizes = [8, 32], strides = [1, 1]} : vector<8x96xf32> to vector<8x32xf32>
    %248 = vector.extract_strided_slice %236 {offsets = [0, 64], sizes = [8, 32], strides = [1, 1]} : vector<8x96xf32> to vector<8x32xf32>
    %249 = arith.mulf %245, %248 : vector<8x32xf32>
    %250 = arith.addf %247, %249 : vector<8x32xf32>
    %251 = math.tanh %250 : vector<8x32xf32>
    %cst_33 = arith.constant 1.000000e+00 : f32
    %252 = vector.broadcast %cst_33 : f32 to vector<8x32xf32>
    %253 = arith.subf %252, %246 : vector<8x32xf32>
    %254 = arith.mulf %253, %251 : vector<8x32xf32>
    %255 = arith.mulf %246, %225 : vector<8x32xf32>
    %256 = arith.addf %254, %255 : vector<8x32xf32>
    %c6_i32 = arith.constant 6 : i32
    %257 = vector.broadcast %c6_i32 : i32 to vector<8x1xi32>
    %258 = arith.cmpi sgt, %8, %257 : vector<8x1xi32>
    %259 = vector.shape_cast %258 : vector<8x1xi1> to vector<8x1xi1>
    %260 = vector.broadcast %259 : vector<8x1xi1> to vector<8x32xi1>
    %261 = arith.select %260, %256, %225 : vector<8x32xi1>, vector<8x32xf32>
    %262 = vector.extract_strided_slice %7 {offsets = [0, 7], sizes = [8, 1], strides = [1, 1]} : vector<8x8xi32> to vector<8x1xi32>
    %263 = vector.broadcast %262 : vector<8x1xi32> to vector<8x128xi32>
    %264 = arith.cmpi eq, %9, %263 : vector<8x128xi32>
    %265 = arith.extui %264 : vector<8x128xi1> to vector<8x128xi32>
    %266 = arith.sitofp %265 : vector<8x128xi32> to vector<8x128xf32>
    %cst_34 = arith.constant dense<0.000000e+00> : vector<8x96xf32>
    %267 = tpu.matmul %266, %0, %cst_34 {dimension_numbers = #tpu.dot_dimension_numbers<[1], [0], [0], [1], [0, 0, 1, 1], [], []>} : vector<8x128xf32>, vector<128x96xf32>, vector<8x96xf32> -> vector<8x96xf32>
    %268 = tpu.concatenate %261, %261 in 1 : vector<8x32xf32>, vector<8x32xf32> -> vector<8x64xf32>
    %269 = arith.mulf %268, %5 : vector<8x64xf32>
    %270 = arith.truncf %269 : vector<8x64xf32> to vector<8x64xbf16>
    %cst_35 = arith.constant dense<0.000000e+00> : vector<8x96xf32>
    %271 = tpu.matmul %270, %2, %cst_35 {dimension_numbers = #tpu.dot_dimension_numbers<[1], [0], [0], [1], [0, 0, 1, 1], [], []>} : vector<8x64xbf16>, vector<64x96xbf16>, vector<8x96xf32> -> vector<8x96xf32>
    %272 = arith.addf %271, %3 : vector<8x96xf32>
    %273 = vector.extract_strided_slice %267 {offsets = [0, 0], sizes = [8, 64], strides = [1, 1]} : vector<8x96xf32> to vector<8x64xf32>
    %274 = vector.extract_strided_slice %272 {offsets = [0, 0], sizes = [8, 64], strides = [1, 1]} : vector<8x96xf32> to vector<8x64xf32>
    %275 = arith.addf %273, %274 : vector<8x64xf32>
    %276 = arith.negf %275 : vector<8x64xf32>
    %277 = math.exp %276 : vector<8x64xf32>
    %cst_36 = arith.constant 1.000000e+00 : f32
    %278 = vector.broadcast %cst_36 : f32 to vector<8x64xf32>
    %279 = arith.addf %278, %277 : vector<8x64xf32>
    %280 = arith.divf %278, %279 : vector<8x64xf32>
    %281 = vector.extract_strided_slice %280 {offsets = [0, 0], sizes = [8, 32], strides = [1, 1]} : vector<8x64xf32> to vector<8x32xf32>
    %282 = vector.extract_strided_slice %280 {offsets = [0, 32], sizes = [8, 32], strides = [1, 1]} : vector<8x64xf32> to vector<8x32xf32>
    %283 = vector.extract_strided_slice %267 {offsets = [0, 64], sizes = [8, 32], strides = [1, 1]} : vector<8x96xf32> to vector<8x32xf32>
    %284 = vector.extract_strided_slice %272 {offsets = [0, 64], sizes = [8, 32], strides = [1, 1]} : vector<8x96xf32> to vector<8x32xf32>
    %285 = arith.mulf %281, %284 : vector<8x32xf32>
    %286 = arith.addf %283, %285 : vector<8x32xf32>
    %287 = math.tanh %286 : vector<8x32xf32>
    %cst_37 = arith.constant 1.000000e+00 : f32
    %288 = vector.broadcast %cst_37 : f32 to vector<8x32xf32>
    %289 = arith.subf %288, %282 : vector<8x32xf32>
    %290 = arith.mulf %289, %287 : vector<8x32xf32>
    %291 = arith.mulf %282, %261 : vector<8x32xf32>
    %292 = arith.addf %290, %291 : vector<8x32xf32>
    %c7_i32 = arith.constant 7 : i32
    %293 = vector.broadcast %c7_i32 : i32 to vector<8x1xi32>
    %294 = arith.cmpi sgt, %8, %293 : vector<8x1xi32>
    %295 = vector.shape_cast %294 : vector<8x1xi1> to vector<8x1xi1>
    %296 = vector.broadcast %295 : vector<8x1xi1> to vector<8x32xi1>
    %297 = arith.select %296, %292, %261 : vector<8x32xi1>, vector<8x32xf32>
    %c0_38 = arith.constant 0 : index
    %c0_39 = arith.constant 0 : index
    %298 = vector.load %arg2[%c0_38, %c0_39] : memref<104x128xf32, #tpu.memory_space<vmem>>, vector<32x128xf32>
    %c32 = arith.constant 32 : index
    %c0_40 = arith.constant 0 : index
    %299 = vector.load %arg2[%c32, %c0_40] : memref<104x128xf32, #tpu.memory_space<vmem>>, vector<32x128xf32>
    %c64 = arith.constant 64 : index
    %c0_41 = arith.constant 0 : index
    %300 = vector.load %arg2[%c64, %c0_41] : memref<104x128xf32, #tpu.memory_space<vmem>>, vector<32x128xf32>
    %c96 = arith.constant 96 : index
    %c0_42 = arith.constant 0 : index
    %301 = vector.load %arg2[%c96, %c0_42] : memref<104x128xf32, #tpu.memory_space<vmem>>, vector<8x128xf32>
    %302 = vector.extract_strided_slice %301 {offsets = [0, 0], sizes = [1, 128], strides = [1, 1]} : vector<8x128xf32> to vector<1x128xf32>
    %303 = vector.extract_strided_slice %301 {offsets = [1, 0], sizes = [1, 128], strides = [1, 1]} : vector<8x128xf32> to vector<1x128xf32>
    %304 = vector.extract_strided_slice %301 {offsets = [2, 0], sizes = [1, 1], strides = [1, 1]} : vector<8x128xf32> to vector<1x1xf32>
    %305 = vector.extract_strided_slice %301 {offsets = [3, 0], sizes = [1, 128], strides = [1, 1]} : vector<8x128xf32> to vector<1x128xf32>
    %306 = vector.extract_strided_slice %297 {offsets = [0, 0], sizes = [4, 32], strides = [1, 1]} : vector<8x32xf32> to vector<4x32xf32>
    %307 = vector.extract_strided_slice %297 {offsets = [4, 0], sizes = [4, 32], strides = [1, 1]} : vector<8x32xf32> to vector<4x32xf32>
    %cst_43 = arith.constant dense<0.000000e+00> : vector<4x128xf32>
    %308 = tpu.matmul %306, %298, %cst_43 {dimension_numbers = #tpu.dot_dimension_numbers<[1], [0], [0], [1], [0, 0, 1, 1], [], []>} : vector<4x32xf32>, vector<32x128xf32>, vector<4x128xf32> -> vector<4x128xf32>
    %cst_44 = arith.constant dense<0.000000e+00> : vector<4x128xf32>
    %309 = tpu.matmul %307, %299, %cst_44 {dimension_numbers = #tpu.dot_dimension_numbers<[1], [0], [0], [1], [0, 0, 1, 1], [], []>} : vector<4x32xf32>, vector<32x128xf32>, vector<4x128xf32> -> vector<4x128xf32>
    %310 = arith.addf %308, %309 : vector<4x128xf32>
    %311 = vector.broadcast %302 : vector<1x128xf32> to vector<4x128xf32>
    %312 = arith.addf %310, %311 : vector<4x128xf32>
    %cst_45 = arith.constant 0.000000e+00 : f32
    %313 = vector.broadcast %cst_45 : f32 to vector<4x128xf32>
    %314 = arith.maximumf %312, %313 : vector<4x128xf32>
    %315 = vector.broadcast %303 : vector<1x128xf32> to vector<4x128xf32>
    %316 = arith.mulf %314, %315 : vector<4x128xf32>
    %cst_46 = arith.constant dense<0.000000e+00> : vector<4xf32>
    %317 = vector.multi_reduction <add>, %316, %cst_46 [1] : vector<4x128xf32> to vector<4xf32>
    %318 = vector.shape_cast %317 : vector<4xf32> to vector<4x1xf32>
    %319 = vector.broadcast %304 : vector<1x1xf32> to vector<4x1xf32>
    %320 = arith.addf %318, %319 : vector<4x1xf32>
    %321 = arith.negf %320 : vector<4x1xf32>
    %322 = math.exp %321 : vector<4x1xf32>
    %cst_47 = arith.constant 1.000000e+00 : f32
    %323 = vector.broadcast %cst_47 : f32 to vector<4x1xf32>
    %324 = arith.addf %323, %322 : vector<4x1xf32>
    %325 = arith.divf %323, %324 : vector<4x1xf32>
    %326 = vector.broadcast %325 : vector<4x1xf32> to vector<4x32xf32>
    %327 = arith.mulf %306, %326 : vector<4x32xf32>
    %cst_48 = arith.constant 1.000000e+00 : f32
    %328 = vector.broadcast %cst_48 : f32 to vector<4x1xf32>
    %329 = arith.subf %328, %325 : vector<4x1xf32>
    %330 = vector.broadcast %329 : vector<4x1xf32> to vector<4x32xf32>
    %331 = arith.mulf %307, %330 : vector<4x32xf32>
    %332 = arith.addf %327, %331 : vector<4x32xf32>
    %cst_49 = arith.constant dense<0.000000e+00> : vector<4x128xf32>
    %333 = tpu.matmul %332, %300, %cst_49 {dimension_numbers = #tpu.dot_dimension_numbers<[1], [0], [0], [1], [0, 0, 1, 1], [], []>} : vector<4x32xf32>, vector<32x128xf32>, vector<4x128xf32> -> vector<4x128xf32>
    %334 = vector.broadcast %305 : vector<1x128xf32> to vector<4x128xf32>
    %335 = arith.addf %333, %334 : vector<4x128xf32>
    %cst_50 = arith.constant 0.000000e+00 : f32
    %336 = vector.broadcast %cst_50 : f32 to vector<4x128xf32>
    %337 = tpu.concatenate %335, %336 in 0 : vector<4x128xf32>, vector<4x128xf32> -> vector<8x128xf32>
    %c0_51 = arith.constant 0 : index
    %c0_52 = arith.constant 0 : index
    %338 = vector.load %arg3[%c0_51, %c0_52] : memref<8x128xf32, #tpu.memory_space<vmem>>, vector<8x128xf32>
    tpu.vector_store %arg3[%c0_51, %c0_52], %337 {strides = array<i32>} : memref<8x128xf32, #tpu.memory_space<vmem>>, vector<8x128xf32>,
    return
  }
}

</mosaic_0001>

<bundles_post_ra>
// kernel: raw_anon_forward.1
= control target key start
LH: loop header
LB: loop body
LE: loop exit
PB: predicated region body
PF: predicated region fallthrough
CT: control target
= control target key end

     0   :  { %v1070_v1 = vmov 0   ;;  %s1071_s16 = smov 32   ;;  %vm79_vm0 = vcmask 261120   ;;  %v47_v34 = vlaneseq  ;;  %vm83_vm1 = vcmask 523264   ;;  %s1073_s15 = smov 64   ;;  %s1593_s1 = inlined_call_operand.vmem [shape: f32[216,96], index: 1, kind: input, shape index: {}]   ;;  %s1594_s0 = inlined_call_operand.vmem [shape: s32[8,9], index: 0, kind: input, shape index: {}]   ;;  %s1595_s2 = inlined_call_operand.vmem [shape: f32[104,128], index: 2, kind: input, shape index: {}]   ;;  %s1596_s3 = inlined_call_operand.vmem [shape: f32[8,128], index: 3, kind: output, shape index: {}]  }
   0x1   :  { %v1106_v0 = vld [vmem:[%s1593_s1 + $0xc8] sm:$0xff]  ;;  %1003 = vset.pattern.permute.xlu0 %v1070_v1  ;;  %v1112_v2 = vld [vmem:[%s1593_s1 + $0x78] sm:$0xff]  ;;  %v1119_v3 = vld [vmem:[%s1593_s1 + $0x70] sm:$0xff]  ;;  %v1072_v39 = vmov 1.0   ;;  %v1074_v61 = vmov 8  }
   0x2   :  { %76 = vrot.lane.b32.xlu0 %v1106_v0, %s1071_s16  ;;  %55 = vmatpush.msra.mxu0 %v1112_v2  ;;  %v1124_v4 = vld [vmem:[%s1593_s1 + $0x68] sm:$0xff]  ;;  %v37_v5 = vld [vmem:[%s1593_s1 + $0xb0] sm:$0xff]  ;;  %v38_v6 = vld [vmem:[%s1593_s1 + $0xb8] sm:$0xff]  ;;  %v1316_v37 = vand.u32 127, %v47_v34 }
   0x3   :  { %152 = vmatpush.msra.mxu2 %v1112_v2  ;;  %v1137_v7 = vld [vmem:[%s1593_s1 + $0x60] sm:$0xff]  ;;  %v1139_v8 = vpack.c.bf16 %v38_v6, %v37_v5  ;;  %v36_v10 = vld [vmem:[%s1593_s1 + $0xa8] sm:$0xff]  ;;  %v1157_v12 = vld [vmem:[%s1593_s1 + $0x58] sm:$0xff]  ;;  %1004 = vset.pattern.permute.xlu2 %v1074_v61  ;;  %v1076_v6 = vmov 1  }
   0x4   :  { %56 = vmatpush.msra.mxu0 %v1119_v3  ;;  %v35_v9 = vld [vmem:[%s1593_s1 + $0xa0] sm:$0xff]  ;;  %v33_v14 = vld [vmem:[%s1593_s1 + $0x90] sm:$0xff]  ;;  %v34_v15 = vld [vmem:[%s1593_s1 + $0x98] sm:$0xff]  ;;  %1008 = vset.pattern.permute.xlu1 %v1074_v61 }
   0x5   :  { %153 = vmatpush.msra.mxu2 %v1119_v3  ;;  %v1152_v11 = vld [vmem:[%s1594_s0] sm:$0xff]  ;;  %91 = vmatpush.bf16.msra.mxu1 %v1139_v8  ;;  %v1160_v13 = vpack.c.bf16 %v36_v10, %v35_v9  ;;  %v1174_v16 = vld [vmem:[%s1593_s1 + $0x50] sm:$0xff]  ;;  %v1182_v17 = vld [vmem:[%s1593_s1 + $0x48] sm:$0xff]  ;;  %v1185_v18 = vpack.c.bf16 %v34_v15, %v33_v14 }
   0x6   :  { %57 = vmatpush.msra.mxu0 %v1124_v4  ;;  %186 = vmatpush.bf16.msra.mxu3 %v1139_v8  ;;  %v1193_v19 = vld [vmem:[%s1593_s1 + $0x40] sm:$0xff]  ;;  %v1200_v20 = vld [vmem:[%s1593_s1 + $0x38] sm:$0xff]  ;;  %v1209_v21 = vld [vmem:[%s1593_s1 + $0x30] sm:$0xff]  ;;  %vm139_vm7 = vcmp.gt.s32.totalorder %v1152_v11, 0  ;;  %vm234_vm10 = vcmp.gt.s32.totalorder %v1152_v11, 1 }
   0x7   :  { %154 = vmatpush.msra.mxu2 %v1124_v4  ;;  %v1216_v22 = vld [vmem:[%s1593_s1 + $0x28] sm:$0xff]  ;;  %v1226_v23 = vld [vmem:[%s1593_s1 + $0x20] sm:$0xff]  ;;  %v1238_v26 = vld [vmem:[%s1593_s1 + $0x18] sm:$0xff]  ;;  %v140_v5 = vsel %vm139_vm7, 1, %v1070_v1  ;;  %vm329_vm7 = vcmp.gt.s32.totalorder %v1152_v11, 2 }
   0x8   :  { %58 = vmatpush.msra.mxu0 %v1137_v7  ;;  %v31_v24 = vld [vmem:[%s1593_s1 + $0x80] sm:$0xff]  ;;  %v32_v25 = vld [vmem:[%s1593_s1 + $0x88] sm:$0xff]  ;;  %v1246_v28 = vld [vmem:[%s1593_s1 + $0x10] sm:$0xff] }
   0x9   :  { %155 = vmatpush.msra.mxu2 %v1137_v7  ;;  %92 = vmatpush.bf16.msra.mxu1 %v1160_v13  ;;  %v1240_v27 = vpack.c.bf16 %v32_v25, %v31_v24  ;;  %v1257_v29 = vld [vmem:[%s1593_s1 + $0x8] sm:$0xff]  ;;  %v1266_v30 = vld [vmem:[%s1593_s1] sm:$0xff]  ;;  %v1302_v31 = vld [vmem:[%s1593_s1 + $0xd0] sm:$0xff] }
   0xa   :  { %50 = vperm.xlu0 %1003, %v1152_v11   ;;  %59 = vmatpush.msra.mxu0 %v1157_v12  ;;  %v1335_v40 = vld [vmem:[%s1593_s1 + $0xc0] sm:$0xff]  ;;  %s1075_s1 = smov 96  }
   0xb   :  { %156 = vmatpush.msra.mxu2 %v1157_v12  ;;  %187 = vmatpush.bf16.msra.mxu3 %v1160_v13 }
   0xc   :  { %60 = vmatpush.msra.mxu0 %v1174_v16 }
   0xd   :  { %157 = vmatpush.msra.mxu2 %v1174_v16  ;;  %93 = vmatpush.bf16.msra.mxu1 %v1185_v18 }
   0xe   :  { %61 = vmatpush.msra.mxu0 %v1182_v17 }
   0xf   :  { %158 = vmatpush.msra.mxu2 %v1182_v17  ;;  %188 = vmatpush.bf16.msra.mxu3 %v1185_v18 }
  0x10   :  { %62 = vmatpush.msra.mxu0 %v1193_v19 }
  0x11   :  { %159 = vmatpush.msra.mxu2 %v1193_v19  ;;  %94 = vmatpush.bf16.msra.mxu1 %v1240_v27 }
  0x12   :  { %63 = vmatpush.msra.mxu0 %v1200_v20  ;;  %1006 = vset.pattern.permute.xlu0 %v1074_v61 }
  0x13   :  { %160 = vmatpush.msra.mxu2 %v1200_v20  ;;  %189 = vmatpush.bf16.msra.mxu3 %v1240_v27 }
  0x14   :  { %64 = vmatpush.msra.mxu0 %v1209_v21 }
  0x15   :  { %161 = vmatpush.msra.mxu2 %v1209_v21  ;;  %247 = vmatpush.msrb.mxu1 %v1112_v2 }
  0x16   :  { %65 = vmatpush.msra.mxu0 %v1216_v22 }
  0x17   :  { %162 = vmatpush.msra.mxu2 %v1216_v22  ;;  %281 = vmatpush.bf16.msrb.mxu3 %v1139_v8 }
  0x18   :  { %66 = vmatpush.msra.mxu0 %v1226_v23  ;;  %248 = vmatpush.msrb.mxu1 %v1119_v3 }
  0x19   :  { %163 = vmatpush.msra.mxu2 %v1226_v23 }
  0x1a   :  { %67 = vmatpush.msra.mxu0 %v1238_v26  ;;  %249 = vmatpush.msrb.mxu1 %v1124_v4 }
  0x1b   :  { %164 = vmatpush.msra.mxu2 %v1238_v26  ;;  %282 = vmatpush.bf16.msrb.mxu3 %v1160_v13 }
  0x1c   :  { %68 = vmatpush.msra.mxu0 %v1246_v28  ;;  %250 = vmatpush.msrb.mxu1 %v1137_v7 }
  0x1d   :  { %165 = vmatpush.msra.mxu2 %v1246_v28 }
  0x1e   :  { %69 = vmatpush.msra.mxu0 %v1257_v29  ;;  %251 = vmatpush.msrb.mxu1 %v1157_v12 }
  0x1f   :  { %166 = vmatpush.msra.mxu2 %v1257_v29  ;;  %283 = vmatpush.bf16.msrb.mxu3 %v1185_v18 }
  0x20   :  { %70 = vmatpush.msra.mxu0 %v1266_v30  ;;  %252 = vmatpush.msrb.mxu1 %v1174_v16 }
  0x21   :  { %167 = vmatpush.msra.mxu2 %v1266_v30 }
  0x22   :  { %342 = vmatpush.msrb.mxu0 %v1112_v2  ;;  %253 = vmatpush.msrb.mxu1 %v1182_v17 }
  0x23   :  { %376 = vmatpush.bf16.msrb.mxu2 %v1139_v8  ;;  %284 = vmatpush.bf16.msrb.mxu3 %v1240_v27 }
  0x24   :  { %343 = vmatpush.msrb.mxu0 %v1119_v3  ;;  %254 = vmatpush.msrb.mxu1 %v1193_v19 }
  0x26   :  { %344 = vmatpush.msrb.mxu0 %v1124_v4  ;;  %255 = vmatpush.msrb.mxu1 %v1200_v20 }
  0x27   :  { %377 = vmatpush.bf16.msrb.mxu2 %v1160_v13 }
  0x28   :  { %345 = vmatpush.msrb.mxu0 %v1137_v7  ;;  %256 = vmatpush.msrb.mxu1 %v1209_v21 }
  0x2a   :  { %346 = vmatpush.msrb.mxu0 %v1157_v12  ;;  %257 = vmatpush.msrb.mxu1 %v1216_v22 }
  0x2b   :  { %378 = vmatpush.bf16.msrb.mxu2 %v1185_v18 }
  0x2c   :  { %347 = vmatpush.msrb.mxu0 %v1174_v16  ;;  %258 = vmatpush.msrb.mxu1 %v1226_v23 }
  0x2e   :  { %348 = vmatpush.msrb.mxu0 %v1182_v17  ;;  %259 = vmatpush.msrb.mxu1 %v1238_v26 }
  0x2f   :  { %379 = vmatpush.bf16.msrb.mxu2 %v1240_v27 }
  0x30   :  { %349 = vmatpush.msrb.mxu0 %v1193_v19  ;;  %260 = vmatpush.msrb.mxu1 %v1246_v28 }
  0x32   :  { %350 = vmatpush.msrb.mxu0 %v1200_v20  ;;  %261 = vmatpush.msrb.mxu1 %v1257_v29 }
  0x34   :  { %351 = vmatpush.msrb.mxu0 %v1209_v21  ;;  %262 = vmatpush.msrb.mxu1 %v1266_v30 }
  0x36   :  { %352 = vmatpush.msrb.mxu0 %v1216_v22 }
  0x38   :  { %353 = vmatpush.msrb.mxu0 %v1226_v23 }
  0x3a   :  { %354 = vmatpush.msrb.mxu0 %v1238_v26 }
  0x3c   :  { %355 = vmatpush.msrb.mxu0 %v1246_v28 }
  0x3e   :  { %356 = vmatpush.msrb.mxu0 %v1257_v29 }
  0x40   :  { %357 = vmatpush.msrb.mxu0 %v1266_v30 }
  0x74   :  { %v1306_v32 = vpop.permute.xlu0 %76 }
  0x75   :  { %v80_v33 = vsel %vm79_vm0, %v1106_v0, %v1306_v32 }
  0x76   :  { %v81_v35 = vmul.f32 %v80_v33, %v1302_v31 }
  0x78   :  { %v82_v36 = vpack.c.bf16 %v81_v35, %v81_v35 }
  0x7a   :  { %956 = vmatmul.msk.bf16.vlgmr.msra.gmra.mxu1 %vm83_vm1, %v82_v36 }
  0x7b   :  { %471 = vmatpush.bf16.msra.mxu1 %v1139_v8 }
  0x7c   :  { %v51_v38 = vpop.permute.xlu0 %50 }
  0x7d   :  { %vm52_vm2 = vcmp.eq.s32.totalorder %v1316_v37, %v51_v38 }
  0x7e   :  { %955 = vmatmul.msk.f32.vlgmr.msra.gmra.mxu0 %vm52_vm2, %v1072_v39 }
  0x7f   :  { %472 = vmatpush.bf16.msra.mxu1 %v1160_v13  ;;  %566 = vmatpush.bf16.msra.mxu0 %v1139_v8 }
  0x83   :  { %473 = vmatpush.bf16.msra.mxu1 %v1185_v18  ;;  %567 = vmatpush.bf16.msra.mxu0 %v1160_v13 }
  0x87   :  { %474 = vmatpush.bf16.msra.mxu1 %v1240_v27  ;;  %568 = vmatpush.bf16.msra.mxu0 %v1185_v18 }
  0x8b   :  { %569 = vmatpush.bf16.msra.mxu0 %v1240_v27 }
  0xf7   :  { %v96_v41 = vpop.f32.mrf.mxu1 }
  0xf8   :  { %v97_v42 = vadd.f32 %v96_v41, %v1335_v40 }
  0xfa   :  { %121 = vrot.lane.b32.xlu1 %v97_v42, %s1073_s15 }
  0xfb   :  { %v72_v44 = vpop.f32.mrf.mxu0 }
  0xfc   :  { %v100_v45 = vadd.f32 %v97_v42, %v72_v44 }
  0xfe   :  { %v957_v46 = vmul.f32 -1.442695, %v100_v45 }
  0xff   :  { %v98_v43 = vpop.f32.mrf.mxu1 }
 0x100   :  { %1017 = vpow2.f32 %v957_v46 }
 0x106   :  { %v1018_v47 = vpop.eup %1017 }
 0x107   :  { %v104_v48 = vadd.f32 1.0, %v1018_v47 }
 0x109   :  { %1019 = vrcp.f32 %v104_v48  ;;  %v116_v54 = vand.u32 2147483648, %v104_v48  ;;  %vm110_vm4 = vweird.f32 %v104_v48  ;;  %v114_v55 = vand.u32 2147483647, %v104_v48 }
 0x10b   :  { %v117_v57 = vor.u32 1.1754944e-38, %v116_v54  ;;  %vm115_vm6 = vcmp.eq.f32.partialorder %v114_v55, 8.507059e+37 }
 0x10f   :  { %v1020_v49 = vpop.eup %1019 }
 0x110   :  { %v106_v50 = vmul.f32 %v1020_v49, %v104_v48  ;;  %vm111_vm3 = vweird.f32 %v1020_v49 }
 0x111   :  { %vm112_vm5 = vmor %vm110_vm4, %vm111_vm3 }
 0x112   :  { %v107_v51 = vsub.f32 1.0, %v106_v50 }
 0x114   :  { %v108_v52 = vmul.f32 %v1020_v49, %v107_v51 }
 0x116   :  { %v109_v53 = vadd.f32 %v1020_v49, %v108_v52 }
 0x118   :  { %v113_v56 = vsel %vm112_vm5, %v1020_v49, %v109_v53  ;;  %v235_v49 = vsel %vm234_vm10, 1, %v1070_v1 }
 0x119   :  { %v118_v59 = vsel %vm115_vm6, %v117_v57, %v113_v56 }
 0x11a   :  { %v131_v10 = vsub.f32 1.0, %v118_v59  ;;  %v137_v15 = vmul.f32 %v118_v59, %v1306_v32 }
 0x16c   :  { %v122_v58 = vpop.permute.xlu1 %121 }
 0x16d   :  { %v124_v60 = vmul.f32 %v122_v58, %v118_v59 }
 0x16f   :  { %126 = vrot.lane.b32.xlu1 %v124_v60, %s1073_s15 }
 0x1e1   :  { %v127_v62 = vpop.permute.xlu1 %126 }
 0x1e2   :  { %v129_v63 = vadd.f32 %v127_v62, %v72_v44 }
 0x1e4   :  { %1021 = vtanh.f32 %v129_v63 }
 0x1ea   :  { %v1022_v0 = vpop.eup %1021 }
 0x1eb   :  { %133 = vrot.lane.b32.xlu2 %v1022_v0, %s1075_s1 }
 0x1f3   :  { %142 = vperm.xlu2 %1004, %v140_v5  }
 0x1fb   :  { %1005 = vset.pattern.permute.xlu2 %v1076_v6  ;;  %v1077_v6 = vmov 2  }
 0x1fc   :  { %147 = vperm.xlu2 %1005, %v1152_v11  }
 0x204   :  { %1007 = vset.pattern.permute.xlu2 %v1077_v6 }
 0x245   :  { %v134_v9 = vpop.permute.xlu2 %133 }
 0x246   :  { %v136_v14 = vmul.f32 %v134_v9, %v131_v10 }
 0x248   :  { %v138_v24 = vadd.f32 %v137_v15, %v136_v14 }
 0x24d   :  { %v143_v25 = vpop.permute.xlu2 %142 }
 0x24e   :  { %vm144_vm8 = vcmp.eq.s32.totalorder %v143_v25, 1 }
 0x24f   :  { %v1349_v33 = vsel %vm144_vm8, %v138_v24, %v1306_v32 }
 0x250   :  { %173 = vrot.lane.b32.xlu1 %v1349_v33, %s1075_s1 }
 0x256   :  { %v148_v34 = vpop.permute.xlu2 %147 }
 0x257   :  { %vm149_vm9 = vcmp.eq.s32.totalorder %v1316_v37, %v148_v34 }
 0x258   :  { %959 = vmatmul.msk.f32.vlgmr.msra.gmra.mxu2 %vm149_vm9, %v1072_v39 }
 0x259   :  { %532 = vmatpush.msra.mxu2 %v1112_v2 }
 0x25b   :  { %533 = vmatpush.msra.mxu2 %v1119_v3 }
 0x25d   :  { %534 = vmatpush.msra.mxu2 %v1124_v4 }
 0x25f   :  { %535 = vmatpush.msra.mxu2 %v1137_v7 }
 0x261   :  { %536 = vmatpush.msra.mxu2 %v1157_v12 }
 0x263   :  { %537 = vmatpush.msra.mxu2 %v1174_v16 }
 0x265   :  { %538 = vmatpush.msra.mxu2 %v1182_v17 }
 0x267   :  { %539 = vmatpush.msra.mxu2 %v1193_v19 }
 0x269   :  { %540 = vmatpush.msra.mxu2 %v1200_v20 }
 0x26b   :  { %541 = vmatpush.msra.mxu2 %v1209_v21 }
 0x26d   :  { %542 = vmatpush.msra.mxu2 %v1216_v22 }
 0x26f   :  { %543 = vmatpush.msra.mxu2 %v1226_v23 }
 0x271   :  { %544 = vmatpush.msra.mxu2 %v1238_v26 }
 0x273   :  { %545 = vmatpush.msra.mxu2 %v1246_v28 }
 0x275   :  { %546 = vmatpush.msra.mxu2 %v1257_v29 }
 0x277   :  { %547 = vmatpush.msra.mxu2 %v1266_v30 }
 0x2c2   :  { %v174_v32 = vpop.permute.xlu1 %173 }
 0x2c3   :  { %v176_v35 = vsel %vm79_vm0, %v174_v32, %v1349_v33 }
 0x2c4   :  { %v177_v36 = vmul.f32 %v176_v35, %v1302_v31 }
 0x2c6   :  { %v178_v38 = vpack.c.bf16 %v177_v36, %v177_v36 }
 0x2c8   :  { %960 = vmatmul.msk.bf16.vlgmr.msra.gmra.mxu3 %vm83_vm1, %v178_v38 }
 0x2c9   :  { %437 = vmatpush.msra.mxu3 %v1112_v2 }
 0x2cb   :  { %438 = vmatpush.msra.mxu3 %v1119_v3 }
 0x2cd   :  { %439 = vmatpush.msra.mxu3 %v1124_v4 }
 0x2cf   :  { %440 = vmatpush.msra.mxu3 %v1137_v7 }
 0x2d1   :  { %441 = vmatpush.msra.mxu3 %v1157_v12 }
 0x2d3   :  { %442 = vmatpush.msra.mxu3 %v1174_v16 }
 0x2d5   :  { %443 = vmatpush.msra.mxu3 %v1182_v17 }
 0x2d7   :  { %444 = vmatpush.msra.mxu3 %v1193_v19 }
 0x2d9   :  { %445 = vmatpush.msra.mxu3 %v1200_v20 }
 0x2db   :  { %446 = vmatpush.msra.mxu3 %v1209_v21  ;;  %v169_v44 = vpop.f32.mrf.mxu2 }
 0x2dd   :  { %447 = vmatpush.msra.mxu3 %v1216_v22 }
 0x2df   :  { %448 = vmatpush.msra.mxu3 %v1226_v23 }
 0x2e1   :  { %449 = vmatpush.msra.mxu3 %v1238_v26 }
 0x2e3   :  { %450 = vmatpush.msra.mxu3 %v1246_v28 }
 0x2e5   :  { %451 = vmatpush.msra.mxu3 %v1257_v29 }
 0x2e7   :  { %452 = vmatpush.msra.mxu3 %v1266_v30 }
 0x34b   :  { %v191_v41 = vpop.f32.mrf.mxu3 }
 0x34c   :  { %v192_v42 = vadd.f32 %v191_v41, %v1335_v40 }
 0x34e   :  { %216 = vrot.lane.b32.xlu0 %v192_v42, %s1073_s15  ;;  %v195_v45 = vadd.f32 %v192_v42, %v169_v44 }
 0x350   :  { %v961_v46 = vmul.f32 -1.442695, %v195_v45 }
 0x352   :  { %1023 = vpow2.f32 %v961_v46 }
 0x353   :  { %v193_v43 = vpop.f32.mrf.mxu3 }
 0x356   :  { %237 = vperm.xlu0 %1006, %v235_v49  }
 0x358   :  { %v1024_v47 = vpop.eup %1023 }
 0x359   :  { %v199_v48 = vadd.f32 1.0, %v1024_v47 }
 0x35b   :  { %1025 = vrcp.f32 %v199_v48  ;;  %v211_v55 = vand.u32 2147483648, %v199_v48  ;;  %vm205_vm12 = vweird.f32 %v199_v48  ;;  %v209_v56 = vand.u32 2147483647, %v199_v48 }
 0x35d   :  { %v212_v58 = vor.u32 1.1754944e-38, %v211_v55  ;;  %vm210_vm14 = vcmp.eq.f32.partialorder %v209_v56, 8.507059e+37 }
 0x361   :  { %v1026_v50 = vpop.eup %1025 }
 0x362   :  { %v201_v51 = vmul.f32 %v1026_v50, %v199_v48  ;;  %vm206_vm11 = vweird.f32 %v1026_v50 }
 0x363   :  { %vm207_vm13 = vmor %vm205_vm12, %vm206_vm11 }
 0x364   :  { %v202_v52 = vsub.f32 1.0, %v201_v51 }
 0x366   :  { %v203_v53 = vmul.f32 %v1026_v50, %v202_v52 }
 0x368   :  { %v204_v54 = vadd.f32 %v1026_v50, %v203_v53 }
 0x36a   :  { %v208_v57 = vsel %vm207_vm13, %v1026_v50, %v204_v54 }
 0x36b   :  { %v213_v60 = vsel %vm210_vm14, %v212_v58, %v208_v57  ;;  %vm424_vm14 = vcmp.gt.s32.totalorder %v1152_v11, 3 }
 0x36c   :  { %v226_v9 = vsub.f32 1.0, %v213_v60  ;;  %v232_v15 = vmul.f32 %v213_v60, %v1349_v33 }
 0x3c0   :  { %v217_v59 = vpop.permute.xlu0 %216 }
 0x3c1   :  { %v219_v62 = vmul.f32 %v217_v59, %v213_v60  ;;  %v330_v60 = vsel %vm329_vm7, 1, %v1070_v1 }
 0x3c3   :  { %221 = vrot.lane.b32.xlu1 %v219_v62, %s1073_s15  ;;  %v1078_v62 = vmov 3  }
 0x3c4   :  { %1009 = vset.pattern.permute.xlu0 %v1078_v62 }
 0x3c8   :  { %v238_v10 = vpop.permute.xlu0 %237 }
 0x3c9   :  { %vm239_vm15 = vcmp.eq.s32.totalorder %v238_v10, 1 }
 0x435   :  { %v222_v63 = vpop.permute.xlu1 %221 }
 0x436   :  { %v224_v0 = vadd.f32 %v222_v63, %v169_v44 }
 0x438   :  { %1027 = vtanh.f32 %v224_v0 }
 0x43e   :  { %v1028_v5 = vpop.eup %1027 }
 0x43f   :  { %228 = vrot.lane.b32.xlu2 %v1028_v5, %s1075_s1 }
 0x447   :  { %242 = vperm.xlu2 %1007, %v1152_v11  }
 0x44f   :  { %1010 = vset.pattern.permute.xlu2 %v1074_v61 }
 0x499   :  { %v229_v14 = vpop.permute.xlu2 %228 }
 0x49a   :  { %v231_v24 = vmul.f32 %v229_v14, %v226_v9 }
 0x49c   :  { %v233_v25 = vadd.f32 %v232_v15, %v231_v24 }
 0x49e   :  { %v1401_v34 = vsel %vm239_vm15, %v233_v25, %v1349_v33 }
 0x49f   :  { %268 = vrot.lane.b32.xlu1 %v1401_v34, %s1075_s1 }
 0x4a1   :  { %v243_v32 = vpop.permute.xlu2 %242 }
 0x4a2   :  { %vm244_vm2 = vcmp.eq.s32.totalorder %v1316_v37, %v243_v32 }
 0x4a3   :  { %963 = vmatmul.msk.f32.vlgmr.msrb.gmra.mxu1 %vm244_vm2, %v1072_v39 }
 0x4a4   :  { %627 = vmatpush.msrb.mxu1 %v1112_v2 }
 0x4a6   :  { %628 = vmatpush.msrb.mxu1 %v1119_v3 }
 0x4a8   :  { %629 = vmatpush.msrb.mxu1 %v1124_v4 }
 0x4aa   :  { %630 = vmatpush.msrb.mxu1 %v1137_v7 }
 0x4ac   :  { %631 = vmatpush.msrb.mxu1 %v1157_v12 }
 0x4ae   :  { %632 = vmatpush.msrb.mxu1 %v1174_v16 }
 0x4b0   :  { %633 = vmatpush.msrb.mxu1 %v1182_v17 }
 0x4b2   :  { %634 = vmatpush.msrb.mxu1 %v1193_v19 }
 0x4b4   :  { %635 = vmatpush.msrb.mxu1 %v1200_v20 }
 0x4b6   :  { %636 = vmatpush.msrb.mxu1 %v1209_v21 }
 0x4b8   :  { %637 = vmatpush.msrb.mxu1 %v1216_v22 }
 0x4ba   :  { %638 = vmatpush.msrb.mxu1 %v1226_v23 }
 0x4bc   :  { %639 = vmatpush.msrb.mxu1 %v1238_v26 }
 0x4be   :  { %640 = vmatpush.msrb.mxu1 %v1246_v28 }
 0x4c0   :  { %641 = vmatpush.msrb.mxu1 %v1257_v29 }
 0x4c2   :  { %642 = vmatpush.msrb.mxu1 %v1266_v30 }
 0x511   :  { %v269_v61 = vpop.permute.xlu1 %268 }
 0x512   :  { %v271_v33 = vsel %vm79_vm0, %v269_v61, %v1401_v34 }
 0x513   :  { %v272_v35 = vmul.f32 %v271_v33, %v1302_v31 }
 0x515   :  { %v273_v36 = vpack.c.bf16 %v272_v35, %v272_v35 }
 0x517   :  { %964 = vmatmul.msk.bf16.vlgmr.msrb.gmra.mxu3 %vm83_vm1, %v273_v36  ;;  %v425_v36 = vsel %vm424_vm14, 1, %v1070_v1 }
 0x518   :  { %661 = vmatpush.bf16.msrb.mxu3 %v1139_v8 }
 0x51c   :  { %662 = vmatpush.bf16.msrb.mxu3 %v1160_v13 }
 0x520   :  { %663 = vmatpush.bf16.msrb.mxu3 %v1185_v18  ;;  %v264_v43 = vpop.f32.mrf.mxu1 }
 0x524   :  { %664 = vmatpush.bf16.msrb.mxu3 %v1240_v27 }
 0x59a   :  { %v286_v38 = vpop.f32.mrf.mxu3 }
 0x59b   :  { %v287_v41 = vadd.f32 %v286_v38, %v1335_v40 }
 0x59d   :  { %311 = vrot.lane.b32.xlu1 %v287_v41, %s1073_s15  ;;  %v290_v44 = vadd.f32 %v287_v41, %v264_v43 }
 0x59f   :  { %v965_v45 = vmul.f32 -1.442695, %v290_v44 }
 0x5a1   :  { %1029 = vpow2.f32 %v965_v45 }
 0x5a2   :  { %v288_v42 = vpop.f32.mrf.mxu3 }
 0x5a5   :  { %332 = vperm.xlu1 %1008, %v330_v60  }
 0x5a7   :  { %v1030_v46 = vpop.eup %1029 }
 0x5a8   :  { %v294_v47 = vadd.f32 1.0, %v1030_v46 }
 0x5aa   :  { %1031 = vrcp.f32 %v294_v47  ;;  %v306_v53 = vand.u32 2147483648, %v294_v47  ;;  %vm300_vm4 = vweird.f32 %v294_v47  ;;  %v304_v54 = vand.u32 2147483647, %v294_v47 }
 0x5ac   :  { %v307_v56 = vor.u32 1.1754944e-38, %v306_v53  ;;  %vm305_vm6 = vcmp.eq.f32.partialorder %v304_v54, 8.507059e+37 }
 0x5b0   :  { %v1032_v48 = vpop.eup %1031 }
 0x5b1   :  { %v296_v49 = vmul.f32 %v1032_v48, %v294_v47  ;;  %vm301_vm3 = vweird.f32 %v1032_v48 }
 0x5b2   :  { %vm302_vm5 = vmor %vm300_vm4, %vm301_vm3  ;;  %vm519_vm3 = vcmp.gt.s32.totalorder %v1152_v11, 4 }
 0x5b3   :  { %v297_v50 = vsub.f32 1.0, %v296_v49 }
 0x5b5   :  { %v298_v51 = vmul.f32 %v1032_v48, %v297_v50 }
 0x5b7   :  { %v299_v52 = vadd.f32 %v1032_v48, %v298_v51 }
 0x5b9   :  { %v303_v55 = vsel %vm302_vm5, %v1032_v48, %v299_v52 }
 0x5ba   :  { %v308_v58 = vsel %vm305_vm6, %v307_v56, %v303_v55 }
 0x5bb   :  { %v321_v6 = vsub.f32 1.0, %v308_v58  ;;  %v327_v14 = vmul.f32 %v308_v58, %v1401_v34 }
 0x60f   :  { %v312_v57 = vpop.permute.xlu1 %311 }
 0x610   :  { %v314_v59 = vmul.f32 %v312_v57, %v308_v58 }
 0x612   :  { %316 = vrot.lane.b32.xlu2 %v314_v59, %s1073_s15  ;;  %v520_v59 = vsel %vm519_vm3, 1, %v1070_v1 }
 0x617   :  { %v333_v9 = vpop.permute.xlu1 %332 }
 0x618   :  { %vm334_vm8 = vcmp.eq.s32.totalorder %v333_v9, 1 }
 0x66c   :  { %v317_v63 = vpop.permute.xlu2 %316 }
 0x66d   :  { %v319_v0 = vadd.f32 %v317_v63, %v264_v43  ;;  %v1079_v43 = vmov 4  }
 0x66e   :  { %1011 = vset.pattern.permute.xlu1 %v1079_v43 }
 0x66f   :  { %1033 = vtanh.f32 %v319_v0 }
 0x675   :  { %v1034_v5 = vpop.eup %1033 }
 0x676   :  { %323 = vrot.lane.b32.xlu0 %v1034_v5, %s1075_s1 }
 0x67e   :  { %337 = vperm.xlu0 %1009, %v1152_v11  }
 0x686   :  { %1015 = vset.pattern.permute.xlu0 %v1070_v1 }
 0x6e8   :  { %v324_v10 = vpop.permute.xlu0 %323 }
 0x6e9   :  { %v326_v15 = vmul.f32 %v324_v10, %v321_v6 }
 0x6eb   :  { %v328_v24 = vadd.f32 %v327_v14, %v326_v15 }
 0x6ed   :  { %v1441_v25 = vsel %vm334_vm8, %v328_v24, %v1401_v34 }
 0x6ee   :  { %363 = vrot.lane.b32.xlu2 %v1441_v25, %s1075_s1 }
 0x6f0   :  { %v338_v32 = vpop.permute.xlu0 %337 }
 0x6f1   :  { %vm339_vm9 = vcmp.eq.s32.totalorder %v1316_v37, %v338_v32 }
 0x6f2   :  { %967 = vmatmul.msk.f32.vlgmr.msrb.gmra.mxu0 %vm339_vm9, %v1072_v39 }
 0x6f3   :  { %722 = vmatpush.msrb.mxu0 %v1112_v2 }
 0x6f5   :  { %723 = vmatpush.msrb.mxu0 %v1119_v3 }
 0x6f7   :  { %724 = vmatpush.msrb.mxu0 %v1124_v4 }
 0x6f9   :  { %725 = vmatpush.msrb.mxu0 %v1137_v7 }
 0x6fb   :  { %726 = vmatpush.msrb.mxu0 %v1157_v12 }
 0x6fd   :  { %727 = vmatpush.msrb.mxu0 %v1174_v16 }
 0x6ff   :  { %728 = vmatpush.msrb.mxu0 %v1182_v17 }
 0x701   :  { %729 = vmatpush.msrb.mxu0 %v1193_v19 }
 0x703   :  { %730 = vmatpush.msrb.mxu0 %v1200_v20 }
 0x705   :  { %731 = vmatpush.msrb.mxu0 %v1209_v21 }
 0x707   :  { %732 = vmatpush.msrb.mxu0 %v1216_v22 }
 0x709   :  { %733 = vmatpush.msrb.mxu0 %v1226_v23 }
 0x70b   :  { %734 = vmatpush.msrb.mxu0 %v1238_v26 }
 0x70d   :  { %735 = vmatpush.msrb.mxu0 %v1246_v28 }
 0x70f   :  { %736 = vmatpush.msrb.mxu0 %v1257_v29 }
 0x711   :  { %737 = vmatpush.msrb.mxu0 %v1266_v30 }
 0x748   :  { %v364_v2 = vpop.permute.xlu2 %363 }
 0x749   :  { %v366_v3 = vsel %vm79_vm0, %v364_v2, %v1441_v25 }
 0x74a   :  { %v367_v4 = vmul.f32 %v366_v3, %v1302_v31 }
 0x74c   :  { %v368_v7 = vpack.c.bf16 %v367_v4, %v367_v4 }
 0x74e   :  { %968 = vmatmul.msk.bf16.vlgmr.msrb.gmra.mxu2 %vm83_vm1, %v368_v7 }
 0x74f   :  { %756 = vmatpush.bf16.msrb.mxu2 %v1139_v8 }
 0x753   :  { %757 = vmatpush.bf16.msrb.mxu2 %v1160_v13 }
 0x757   :  { %758 = vmatpush.bf16.msrb.mxu2 %v1185_v18 }
 0x75b   :  { %759 = vmatpush.bf16.msrb.mxu2 %v1240_v27 }
 0x76f   :  { %v359_v19 = vpop.f32.mrf.mxu0 }
 0x7d1   :  { %v381_v12 = vpop.f32.mrf.mxu2 }
 0x7d2   :  { %v382_v16 = vadd.f32 %v381_v12, %v1335_v40 }
 0x7d4   :  { %406 = vrot.lane.b32.xlu1 %v382_v16, %s1073_s15  ;;  %v385_v20 = vadd.f32 %v382_v16, %v359_v19 }
 0x7d6   :  { %v969_v21 = vmul.f32 -1.442695, %v385_v20 }
 0x7d8   :  { %1035 = vpow2.f32 %v969_v21 }
 0x7d9   :  { %v383_v17 = vpop.f32.mrf.mxu2 }
 0x7de   :  { %v1036_v22 = vpop.eup %1035 }
 0x7df   :  { %v389_v8 = vadd.f32 1.0, %v1036_v22 }
 0x7e1   :  { %1037 = vrcp.f32 %v389_v8  ;;  %v401_v27 = vand.u32 2147483648, %v389_v8  ;;  %vm395_vm11 = vweird.f32 %v389_v8  ;;  %v399_v29 = vand.u32 2147483647, %v389_v8 }
 0x7e3   :  { %v402_v34 = vor.u32 1.1754944e-38, %v401_v27  ;;  %vm400_vm13 = vcmp.eq.f32.partialorder %v399_v29, 8.507059e+37 }
 0x7e7   :  { %v1038_v23 = vpop.eup %1037 }
 0x7e8   :  { %v391_v26 = vmul.f32 %v1038_v23, %v389_v8  ;;  %vm396_vm10 = vweird.f32 %v1038_v23 }
 0x7e9   :  { %vm397_vm12 = vmor %vm395_vm11, %vm396_vm10  ;;  %vm614_vm10 = vcmp.gt.s32.totalorder %v1152_v11, 5 }
 0x7ea   :  { %v392_v13 = vsub.f32 1.0, %v391_v26 }
 0x7ec   :  { %v393_v28 = vmul.f32 %v1038_v23, %v392_v13 }
 0x7ee   :  { %v394_v18 = vadd.f32 %v1038_v23, %v393_v28 }
 0x7f0   :  { %v398_v30 = vsel %vm397_vm12, %v1038_v23, %v394_v18 }
 0x7f1   :  { %v403_v33 = vsel %vm400_vm13, %v402_v34, %v398_v30 }
 0x7f2   :  { %v416_v44 = vsub.f32 1.0, %v403_v33  ;;  %v422_v47 = vmul.f32 %v403_v33, %v1441_v25 }
 0x846   :  { %v407_v61 = vpop.permute.xlu1 %406 }
 0x847   :  { %v409_v35 = vmul.f32 %v407_v61, %v403_v33 }
 0x849   :  { %411 = vrot.lane.b32.xlu2 %v409_v35, %s1073_s15  ;;  %v615_v35 = vsel %vm614_vm10, 1, %v1070_v1 }
 0x851   :  { %427 = vperm.xlu2 %1010, %v425_v36  }
 0x8a3   :  { %v412_v38 = vpop.permute.xlu2 %411 }
 0x8a4   :  { %v414_v41 = vadd.f32 %v412_v38, %v359_v19  ;;  %v1080_v19 = vmov 5  }
 0x8a6   :  { %1039 = vtanh.f32 %v414_v41 }
 0x8ab   :  { %v428_v45 = vpop.permute.xlu2 %427 }
 0x8ac   :  { %v1040_v42 = vpop.eup %1039  ;;  %vm429_vm15 = vcmp.eq.s32.totalorder %v428_v45, 1 }
 0x8ad   :  { %418 = vrot.lane.b32.xlu1 %v1040_v42, %s1075_s1 }
 0x8b5   :  { %432 = vperm.xlu1 %1011, %v1152_v11  }
 0x8bd   :  { %1012 = vset.pattern.permute.xlu1 %v1080_v19 }
 0x91f   :  { %v419_v46 = vpop.permute.xlu1 %418 }
 0x920   :  { %v421_v48 = vmul.f32 %v419_v46, %v416_v44 }
 0x922   :  { %v423_v49 = vadd.f32 %v422_v47, %v421_v48 }
 0x924   :  { %v430_v50 = vsel %vm429_vm15, %v423_v49, %v1441_v25 }
 0x925   :  { %458 = vrot.lane.b32.xlu0 %v430_v50, %s1075_s1 }
 0x927   :  { %v433_v51 = vpop.permute.xlu1 %432 }
 0x928   :  { %vm434_vm2 = vcmp.eq.s32.totalorder %v1316_v37, %v433_v51 }
 0x929   :  { %971 = vmatmul.msk.f32.vlgmr.msra.gmra.mxu3 %vm434_vm2, %v1072_v39 }
 0x997   :  { %v459_v52 = vpop.permute.xlu0 %458 }
 0x998   :  { %v461_v53 = vsel %vm79_vm0, %v459_v52, %v430_v50 }
 0x999   :  { %v462_v54 = vmul.f32 %v461_v53, %v1302_v31 }
 0x99b   :  { %v463_v55 = vpack.c.bf16 %v462_v54, %v462_v54 }
 0x99d   :  { %972 = vmatmul.msk.bf16.vlgmr.msra.gmra.mxu1 %vm83_vm1, %v463_v55 }
 0x9ac   :  { %v454_v60 = vpop.f32.mrf.mxu3 }
 0xa1a   :  { %v476_v56 = vpop.f32.mrf.mxu1 }
 0xa1b   :  { %v477_v57 = vadd.f32 %v476_v56, %v1335_v40 }
 0xa1d   :  { %501 = vrot.lane.b32.xlu2 %v477_v57, %s1073_s15  ;;  %v480_v62 = vadd.f32 %v477_v57, %v454_v60 }
 0xa1f   :  { %v973_v63 = vmul.f32 -1.442695, %v480_v62 }
 0xa21   :  { %1041 = vpow2.f32 %v973_v63 }
 0xa22   :  { %v478_v58 = vpop.f32.mrf.mxu1 }
 0xa23   :  { %v1081_v58 = vmov 6  }
 0xa25   :  { %522 = vperm.xlu2 %1010, %v520_v59   ;;  %v1508_v59 = vld [vmem:[%s1594_s0] sm:$0xff] }
 0xa26   :  { %vm709_vm3 = vcmp.gt.s32.totalorder %v1508_v59, 6  ;;  %vm804_vm10 = vcmp.gt.s32.totalorder %v1508_v59, 7 }
 0xa27   :  { %v1042_v0 = vpop.eup %1041 }
 0xa28   :  { %v484_v5 = vadd.f32 1.0, %v1042_v0 }
 0xa2a   :  { %1043 = vrcp.f32 %v484_v5  ;;  %v496_v24 = vand.u32 2147483648, %v484_v5  ;;  %vm490_vm5 = vweird.f32 %v484_v5  ;;  %v494_v25 = vand.u32 2147483647, %v484_v5 }
 0xa2c   :  { %v497_v2 = vor.u32 1.1754944e-38, %v496_v24  ;;  %vm495_vm7 = vcmp.eq.f32.partialorder %v494_v25, 8.507059e+37 }
 0xa30   :  { %v1044_v6 = vpop.eup %1043 }
 0xa31   :  { %v486_v9 = vmul.f32 %v1044_v6, %v484_v5  ;;  %vm491_vm4 = vweird.f32 %v1044_v6 }
 0xa32   :  { %vm492_vm6 = vmor %vm490_vm5, %vm491_vm4 }
 0xa33   :  { %v487_v10 = vsub.f32 1.0, %v486_v9 }
 0xa35   :  { %v488_v14 = vmul.f32 %v1044_v6, %v487_v10 }
 0xa37   :  { %v489_v15 = vadd.f32 %v1044_v6, %v488_v14 }
 0xa39   :  { %v493_v32 = vsel %vm492_vm6, %v1044_v6, %v489_v15 }
 0xa3a   :  { %v498_v4 = vsel %vm495_vm7, %v497_v2, %v493_v32 }
 0xa3b   :  { %v511_v20 = vsub.f32 1.0, %v498_v4  ;;  %v517_v8 = vmul.f32 %v498_v4, %v430_v50 }
 0xa77   :  { %v502_v3 = vpop.permute.xlu2 %501 }
 0xa78   :  { %v504_v7 = vmul.f32 %v502_v3, %v498_v4  ;;  %v710_v4 = vsel %vm709_vm3, 1, %v1070_v1 }
 0xa7a   :  { %506 = vrot.lane.b32.xlu0 %v504_v7, %s1073_s15 }
 0xa7f   :  { %v523_v22 = vpop.permute.xlu2 %522 }
 0xa80   :  { %vm524_vm8 = vcmp.eq.s32.totalorder %v523_v22, 1 }
 0xaec   :  { %v507_v12 = vpop.permute.xlu0 %506 }
 0xaed   :  { %v509_v16 = vadd.f32 %v507_v12, %v454_v60 }
 0xaef   :  { %1045 = vtanh.f32 %v509_v16 }
 0xaf5   :  { %v1046_v17 = vpop.eup %1045 }
 0xaf6   :  { %513 = vrot.lane.b32.xlu1 %v1046_v17, %s1075_s1 }
 0xafe   :  { %527 = vperm.xlu1 %1012, %v1152_v11  }
 0xb06   :  { %1013 = vset.pattern.permute.xlu1 %v1081_v58 }
 0xb68   :  { %v514_v21 = vpop.permute.xlu1 %513 }
 0xb69   :  { %v516_v23 = vmul.f32 %v514_v21, %v511_v20 }
 0xb6b   :  { %v518_v26 = vadd.f32 %v517_v8, %v516_v23 }
 0xb6d   :  { %v525_v13 = vsel %vm524_vm8, %v518_v26, %v430_v50 }
 0xb6e   :  { %553 = vrot.lane.b32.xlu0 %v525_v13, %s1075_s1 }
 0xb70   :  { %v528_v28 = vpop.permute.xlu1 %527 }
 0xb71   :  { %vm529_vm9 = vcmp.eq.s32.totalorder %v1316_v37, %v528_v28 }
 0xb72   :  { %975 = vmatmul.msk.f32.vlgmr.msra.gmra.mxu2 %vm529_vm9, %v1072_v39 }
 0xbe0   :  { %v554_v18 = vpop.permute.xlu0 %553 }
 0xbe1   :  { %v556_v27 = vsel %vm79_vm0, %v554_v18, %v525_v13 }
 0xbe2   :  { %v557_v29 = vmul.f32 %v556_v27, %v1302_v31 }
 0xbe4   :  { %v558_v30 = vpack.c.bf16 %v557_v29, %v557_v29 }
 0xbe6   :  { %976 = vmatmul.msk.bf16.vlgmr.msra.gmra.mxu0 %vm83_vm1, %v558_v30 }
 0xbf5   :  { %v549_v36 = vpop.f32.mrf.mxu2 }
 0xc63   :  { %v571_v34 = vpop.f32.mrf.mxu0 }
 0xc64   :  { %v572_v61 = vadd.f32 %v571_v34, %v1335_v40 }
 0xc66   :  { %596 = vrot.lane.b32.xlu2 %v572_v61, %s1073_s15  ;;  %v575_v38 = vadd.f32 %v572_v61, %v549_v36 }
 0xc68   :  { %v977_v41 = vmul.f32 -1.442695, %v575_v38 }
 0xc6a   :  { %1047 = vpow2.f32 %v977_v41 }
 0xc6b   :  { %v573_v33 = vpop.f32.mrf.mxu0 }
 0xc6e   :  { %617 = vperm.xlu2 %1010, %v615_v35   ;;  %v1082_v35 = vmov 7  }
 0xc70   :  { %v1048_v42 = vpop.eup %1047 }
 0xc71   :  { %v579_v43 = vadd.f32 1.0, %v1048_v42 }
 0xc73   :  { %1049 = vrcp.f32 %v579_v43  ;;  %v591_v49 = vand.u32 2147483648, %v579_v43  ;;  %vm585_vm12 = vweird.f32 %v579_v43  ;;  %v589_v11 = vand.u32 2147483647, %v579_v43 }
 0xc75   :  { %v592_v51 = vor.u32 1.1754944e-38, %v591_v49  ;;  %vm590_vm14 = vcmp.eq.f32.partialorder %v589_v11, 8.507059e+37 }
 0xc79   :  { %v1050_v44 = vpop.eup %1049 }
 0xc7a   :  { %v581_v45 = vmul.f32 %v1050_v44, %v579_v43  ;;  %vm586_vm11 = vweird.f32 %v1050_v44 }
 0xc7b   :  { %vm587_vm13 = vmor %vm585_vm12, %vm586_vm11 }
 0xc7c   :  { %v582_v46 = vsub.f32 1.0, %v581_v45 }
 0xc7e   :  { %v583_v47 = vmul.f32 %v1050_v44, %v582_v46 }
 0xc80   :  { %v584_v48 = vadd.f32 %v1050_v44, %v583_v47 }
 0xc82   :  { %v588_v50 = vsel %vm587_vm13, %v1050_v44, %v584_v48 }
 0xc83   :  { %v593_v53 = vsel %vm590_vm14, %v592_v51, %v588_v50 }
 0xc84   :  { %v606_v60 = vsub.f32 1.0, %v593_v53  ;;  %v612_v0 = vmul.f32 %v593_v53, %v525_v13 }
 0xcc0   :  { %v597_v52 = vpop.permute.xlu2 %596 }
 0xcc1   :  { %v599_v54 = vmul.f32 %v597_v52, %v593_v53 }
 0xcc3   :  { %601 = vrot.lane.b32.xlu0 %v599_v54, %s1073_s15 }
 0xcc8   :  { %v618_v63 = vpop.permute.xlu2 %617 }
 0xcc9   :  { %vm619_vm15 = vcmp.eq.s32.totalorder %v618_v63, 1 }
 0xd35   :  { %v602_v55 = vpop.permute.xlu0 %601 }
 0xd36   :  { %v604_v56 = vadd.f32 %v602_v55, %v549_v36 }
 0xd38   :  { %1051 = vtanh.f32 %v604_v56 }
 0xd3e   :  { %v1052_v57 = vpop.eup %1051 }
 0xd3f   :  { %608 = vrot.lane.b32.xlu1 %v1052_v57, %s1075_s1 }
 0xd47   :  { %622 = vperm.xlu1 %1013, %v1508_v59  }
 0xd4f   :  { %1014 = vset.pattern.permute.xlu1 %v1082_v35 }
 0xdb1   :  { %v609_v62 = vpop.permute.xlu1 %608 }
 0xdb2   :  { %v611_v5 = vmul.f32 %v609_v62, %v606_v60 }
 0xdb4   :  { %v613_v6 = vadd.f32 %v612_v0, %v611_v5 }
 0xdb6   :  { %v620_v9 = vsel %vm619_vm15, %v613_v6, %v525_v13  ;;  %vm879_vm15 = vcmask 1043456  }
 0xdb7   :  { %648 = vrot.lane.b32.xlu0 %v620_v9, %s1075_s1 }
 0xdb9   :  { %v623_v10 = vpop.permute.xlu1 %622 }
 0xdba   :  { %vm624_vm2 = vcmp.eq.s32.totalorder %v1316_v37, %v623_v10 }
 0xdbb   :  { %979 = vmatmul.msk.f32.vlgmr.msrb.gmra.mxu1 %vm624_vm2, %v1072_v39 }
 0xe29   :  { %v649_v14 = vpop.permute.xlu0 %648 }
 0xe2a   :  { %v651_v15 = vsel %vm79_vm0, %v649_v14, %v620_v9 }
 0xe2b   :  { %v652_v24 = vmul.f32 %v651_v15, %v1302_v31  ;;  %v818_v15 = vld [vmem:[%s1595_s2 + $0x38] sm:$0xff] }
 0xe2c   :  { %842 = vmatpush.msra.mxu3 %v818_v15 }
 0xe2d   :  { %v653_v25 = vpack.c.bf16 %v652_v24, %v652_v24  ;;  %v817_v24 = vld [vmem:[%s1595_s2 + $0x30] sm:$0xff] }
 0xe2e   :  { %843 = vmatpush.msra.mxu3 %v817_v24 }
 0xe2f   :  { %980 = vmatmul.msk.bf16.vlgmr.msrb.gmra.mxu3 %vm83_vm1, %v653_v25  ;;  %v814_v25 = vld [vmem:[%s1595_s2 + $0x18] sm:$0xff] }
 0xe30   :  { %866 = vmatpush.msra.mxu1 %v814_v25 }
 0xe38   :  { %v644_v7 = vpop.f32.mrf.mxu1 }
 0xeb2   :  { %v666_v32 = vpop.f32.mrf.mxu3 }
 0xeb3   :  { %v667_v2 = vadd.f32 %v666_v32, %v1335_v40  ;;  %v813_v32 = vld [vmem:[%s1595_s2 + $0x10] sm:$0xff] }
 0xeb4   :  { %867 = vmatpush.msra.mxu1 %v813_v32 }
 0xeb5   :  { %691 = vrot.lane.b32.xlu2 %v667_v2, %s1073_s15  ;;  %v670_v12 = vadd.f32 %v667_v2, %v644_v7  ;;  %v816_v2 = vld [vmem:[%s1595_s2 + $0x28] sm:$0xff] }
 0xeb6   :  { %844 = vmatpush.msra.mxu3 %v816_v2 }
 0xeb7   :  { %v981_v16 = vmul.f32 -1.442695, %v670_v12 }
 0xeb9   :  { %1053 = vpow2.f32 %v981_v16 }
 0xeba   :  { %v668_v3 = vpop.f32.mrf.mxu3 }
 0xebb   :  { %v812_v3 = vld [vmem:[%s1595_s2 + $0x8] sm:$0xff] }
 0xebc   :  { %868 = vmatpush.msra.mxu1 %v812_v3 }
 0xebd   :  { %712 = vperm.xlu2 %1010, %v710_v4   ;;  %v815_v4 = vld [vmem:[%s1595_s2 + $0x20] sm:$0xff] }
 0xebe   :  { %845 = vmatpush.msra.mxu3 %v815_v4 }
 0xebf   :  { %v1054_v17 = vpop.eup %1053 }
 0xec0   :  { %v674_v19 = vadd.f32 1.0, %v1054_v17 }
 0xec2   :  { %1055 = vrcp.f32 %v674_v19  ;;  %v686_v26 = vand.u32 2147483648, %v674_v19  ;;  %vm680_vm5 = vweird.f32 %v674_v19  ;;  %v684_v13 = vand.u32 2147483647, %v674_v19 }
 0xec4   :  { %v687_v18 = vor.u32 1.1754944e-38, %v686_v26  ;;  %vm685_vm7 = vcmp.eq.f32.partialorder %v684_v13, 8.507059e+37  ;;  %v823_v13 = vld [vmem:[%s1595_s2 + $0x60] sm:$0xff] }
 0xec8   :  { %v1056_v20 = vpop.eup %1055 }
 0xec9   :  { %v676_v21 = vmul.f32 %v1056_v20, %v674_v19  ;;  %vm681_vm4 = vweird.f32 %v1056_v20 }
 0xeca   :  { %vm682_vm6 = vmor %vm680_vm5, %vm681_vm4 }
 0xecb   :  { %v677_v22 = vsub.f32 1.0, %v676_v21 }
 0xecd   :  { %v678_v8 = vmul.f32 %v1056_v20, %v677_v22 }
 0xecf   :  { %v679_v23 = vadd.f32 %v1056_v20, %v678_v8 }
 0xed1   :  { %v683_v28 = vsel %vm682_vm6, %v1056_v20, %v679_v23 }
 0xed2   :  { %v688_v29 = vsel %vm685_vm7, %v687_v18, %v683_v28  ;;  %v874_v28 = vperm.slane %v823_v13, 0 }
 0xed3   :  { %v701_v36 = vsub.f32 1.0, %v688_v29  ;;  %v707_v42 = vmul.f32 %v688_v29, %v620_v9 }
 0xf0f   :  { %v692_v27 = vpop.permute.xlu2 %691 }
 0xf10   :  { %v694_v30 = vmul.f32 %v692_v27, %v688_v29 }
 0xf12   :  { %696 = vrot.lane.b32.xlu0 %v694_v30, %s1073_s15 }
 0xf17   :  { %v713_v41 = vpop.permute.xlu2 %712 }
 0xf18   :  { %vm714_vm8 = vcmp.eq.s32.totalorder %v713_v41, 1 }
 0xf84   :  { %v697_v34 = vpop.permute.xlu0 %696 }
 0xf85   :  { %v699_v61 = vadd.f32 %v697_v34, %v644_v7  ;;  %v811_v7 = vld [vmem:[%s1595_s2] sm:$0xff]  ;;  %v877_v34 = vperm.slane %v823_v13, 1 }
 0xf86   :  { %869 = vmatpush.msra.mxu1 %v811_v7 }
 0xf87   :  { %1057 = vtanh.f32 %v699_v61 }
 0xf8d   :  { %v1058_v33 = vpop.eup %1057 }
 0xf8e   :  { %703 = vrot.lane.b32.xlu1 %v1058_v33, %s1075_s1 }
 0xf96   :  { %717 = vperm.xlu1 %1014, %v1508_v59  }
 0xf9e   :  { %1016 = vset.pattern.permute.xlu1 %v1070_v1 }
0x1000   :  { %v704_v38 = vpop.permute.xlu1 %703 }
0x1001   :  { %v706_v43 = vmul.f32 %v704_v38, %v701_v36  ;;  %v883_v36 = vperm.slane %v823_v13, 2 }
0x1003   :  { %v708_v44 = vadd.f32 %v707_v42, %v706_v43 }
0x1005   :  { %v1525_v45 = vsel %vm714_vm8, %v708_v44, %v620_v9 }
0x1006   :  { %743 = vrot.lane.b32.xlu0 %v1525_v45, %s1075_s1 }
0x1008   :  { %v718_v46 = vpop.permute.xlu1 %717 }
0x1009   :  { %vm719_vm9 = vcmp.eq.s32.totalorder %v1316_v37, %v718_v46  ;;  %v805_v37 = vsel %vm804_vm10, 1, %v1070_v1 }
0x100a   :  { %983 = vmatmul.msk.f32.vlgmr.msrb.gmra.mxu0 %vm719_vm9, %v1072_v39 }
0x1078   :  { %v744_v47 = vpop.permute.xlu0 %743 }
0x1079   :  { %v746_v48 = vsel %vm79_vm0, %v744_v47, %v1525_v45 }
0x107a   :  { %v747_v49 = vmul.f32 %v746_v48, %v1302_v31 }
0x107c   :  { %v748_v11 = vpack.c.bf16 %v747_v49, %v747_v49 }
0x107e   :  { %984 = vmatmul.msk.bf16.vlgmr.msrb.gmra.mxu2 %vm83_vm1, %v748_v11 }
0x1087   :  { %v739_v39 = vpop.f32.mrf.mxu0 }
0x1101   :  { %v761_v50 = vpop.f32.mrf.mxu2 }
0x1102   :  { %v762_v51 = vadd.f32 %v761_v50, %v1335_v40 }
0x1104   :  { %786 = vrot.lane.b32.xlu2 %v762_v51, %s1073_s15  ;;  %v765_v53 = vadd.f32 %v762_v51, %v739_v39 }
0x1106   :  { %v985_v54 = vmul.f32 -1.442695, %v765_v53  ;;  %v822_v53 = vld [vmem:[%s1595_s2 + $0x58] sm:$0xff] }
0x1107   :  { %940 = vmatpush.msrb.mxu3 %v822_v53 }
0x1108   :  { %1059 = vpow2.f32 %v985_v54  ;;  %v821_v54 = vld [vmem:[%s1595_s2 + $0x50] sm:$0xff] }
0x1109   :  { %v763_v52 = vpop.f32.mrf.mxu2  ;;  %941 = vmatpush.msrb.mxu3 %v821_v54 }
0x110c   :  { %807 = vperm.xlu2 %1010, %v805_v37  }
0x110e   :  { %v1060_v55 = vpop.eup %1059 }
0x110f   :  { %v769_v31 = vadd.f32 1.0, %v1060_v55  ;;  %v820_v55 = vld [vmem:[%s1595_s2 + $0x48] sm:$0xff] }
0x1110   :  { %942 = vmatpush.msrb.mxu3 %v820_v55 }
0x1111   :  { %1061 = vrcp.f32 %v769_v31  ;;  %v781_v62 = vand.u32 2147483648, %v769_v31  ;;  %vm775_vm11 = vweird.f32 %v769_v31  ;;  %v779_v59 = vand.u32 2147483647, %v769_v31 }
0x1113   :  { %v782_v1 = vor.u32 1.1754944e-38, %v781_v62  ;;  %vm780_vm13 = vcmp.eq.f32.partialorder %v779_v59, 8.507059e+37 }
0x1117   :  { %v1062_v56 = vpop.eup %1061 }
0x1118   :  { %v771_v57 = vmul.f32 %v1062_v56, %v769_v31  ;;  %vm776_vm1 = vweird.f32 %v1062_v56  ;;  %v819_v31 = vld [vmem:[%s1595_s2 + $0x40] sm:$0xff] }
0x1119   :  { %vm777_vm12 = vmor %vm775_vm11, %vm776_vm1  ;;  %943 = vmatpush.msrb.mxu3 %v819_v31 }
0x111a   :  { %v772_v58 = vsub.f32 1.0, %v771_v57 }
0x111c   :  { %v773_v60 = vmul.f32 %v1062_v56, %v772_v58 }
0x111e   :  { %v774_v40 = vadd.f32 %v1062_v56, %v773_v60 }
0x1120   :  { %v778_v63 = vsel %vm777_vm12, %v1062_v56, %v774_v40 }
0x1121   :  { %v783_v5 = vsel %vm780_vm13, %v782_v1, %v778_v63  ;;  %v922_v1 = vperm.slane %v823_v13, 3 }
0x1122   :  { %v796_v12 = vsub.f32 1.0, %v783_v5  ;;  %v802_v19 = vmul.f32 %v783_v5, %v1525_v45 }
0x115e   :  { %v787_v0 = vpop.permute.xlu2 %786 }
0x115f   :  { %v789_v6 = vmul.f32 %v787_v0, %v783_v5 }
0x1161   :  { %791 = vrot.lane.b32.xlu0 %v789_v6, %s1073_s15 }
0x1166   :  { %v808_v17 = vpop.permute.xlu2 %807 }
0x1167   :  { %vm809_vm14 = vcmp.eq.s32.totalorder %v808_v17, 1 }
0x11d3   :  { %v792_v9 = vpop.permute.xlu0 %791 }
0x11d4   :  { %v794_v10 = vadd.f32 %v792_v9, %v739_v39 }
0x11d6   :  { %1063 = vtanh.f32 %v794_v10 }
0x11dc   :  { %v1064_v14 = vpop.eup %1063 }
0x11dd   :  { %798 = vrot.lane.b32.xlu1 %v1064_v14, %s1075_s1 }
0x124f   :  { %v799_v16 = vpop.permute.xlu1 %798 }
0x1250   :  { %v801_v20 = vmul.f32 %v799_v16, %v796_v12 }
0x1252   :  { %v803_v21 = vadd.f32 %v802_v19, %v801_v20 }
0x1254   :  { %v810_v22 = vsel %vm809_vm14, %v803_v21, %v1525_v45 }
0x1255   :  { %850 = vrot.lane.b32.xlu1 %v810_v22, %s1075_s1  ;;  %v825_v8 = vrot.slane %v810_v22, 4 }
0x1257   :  { %826 = vrot.lane.b32.xlu0 %v825_v8, %s1075_s1 }
0x12c7   :  { %v851_v23 = vpop.permute.xlu1 %850 }
0x12c8   :  { %987 = vmatmul.msk.f32.vlgmr.msra.gmra.mxu1 %vm79_vm0, %v851_v23 }
0x12c9   :  { %v827_v26 = vpop.permute.xlu0 %826 }
0x12ca   :  { %986 = vmatmul.msk.f32.vlgmr.msra.gmra.mxu3 %vm79_vm0, %v827_v26 }
0x1345   :  { %v871_v18 = vpop.f32.mrf.mxu1 }
0x134d   :  { %v847_v27 = vpop.f32.mrf.mxu3 }
0x134e   :  { %v872_v29 = vadd.f32 %v871_v18, %v847_v27 }
0x1350   :  { %v875_v30 = vadd.f32 %v874_v28, %v872_v29 }
0x1352   :  { %v876_v61 = vmax.f32 %v875_v30, 0.0 }
0x1354   :  { %v878_v33 = vmul.f32 %v877_v34, %v876_v61 }
0x1356   :  { %v880_v35 = vsel %vm879_vm15, %v878_v33, 0.0 }
0x1357   :  { %881 = vadd.xlane.f32.xlu2 %v880_v35 }
0x13ca   :  { %v882_v38 = vpop.xlane.xlu2 %881 }
0x13cb   :  { %v884_v41 = vadd.f32 %v883_v36, %v882_v38 }
0x13cd   :  { %v988_v42 = vmul.f32 -1.442695, %v884_v41 }
0x13cf   :  { %1065 = vpow2.f32 %v988_v42 }
0x13d5   :  { %v1066_v43 = vpop.eup %1065 }
0x13d6   :  { %v888_v44 = vadd.f32 1.0, %v1066_v43 }
0x13d8   :  { %1067 = vrcp.f32 %v888_v44  ;;  %v900_v48 = vand.u32 2147483648, %v888_v44  ;;  %v898_v11 = vand.u32 2147483647, %v888_v44  ;;  %vm894_vm3 = vweird.f32 %v888_v44 }
0x13da   :  { %v901_v51 = vor.u32 1.1754944e-38, %v900_v48  ;;  %vm899_vm5 = vcmp.eq.f32.partialorder %v898_v11, 8.507059e+37 }
0x13de   :  { %v1068_v45 = vpop.eup %1067 }
0x13df   :  { %v890_v46 = vmul.f32 %v1068_v45, %v888_v44  ;;  %vm895_vm2 = vweird.f32 %v1068_v45 }
0x13e0   :  { %vm896_vm4 = vmor %vm894_vm3, %vm895_vm2 }
0x13e1   :  { %v891_v47 = vsub.f32 1.0, %v890_v46 }
0x13e3   :  { %v892_v49 = vmul.f32 %v1068_v45, %v891_v47 }
0x13e5   :  { %v893_v50 = vadd.f32 %v1068_v45, %v892_v49 }
0x13e7   :  { %v897_v52 = vsel %vm896_vm4, %v1068_v45, %v893_v50 }
0x13e8   :  { %v902_v37 = vsel %vm899_vm5, %v901_v51, %v897_v52 }
0x13e9   :  { %906 = vperm.xlu1 %1016, %v902_v37   ;;  %v910_v39 = vsub.f32 1.0, %v902_v37 }
0x13eb   :  { %913 = vperm.xlu0 %1015, %v910_v39  }
0x145b   :  { %v907_v58 = vpop.permute.xlu1 %906 }
0x145c   :  { %v909_v40 = vmul.f32 %v907_v58, %v810_v22 }
0x145d   :  { %v914_v56 = vpop.permute.xlu0 %913 }
0x145e   :  { %v915_v57 = vrot.slane %v914_v56, 4 }
0x1460   :  { %v917_v60 = vmul.f32 %v915_v57, %v810_v22 }
0x1462   :  { %v919_v62 = vrot.slane %v917_v60, 4 }
0x1464   :  { %v921_v59 = vadd.f32 %v919_v62, %v909_v40 }
0x1466   :  { %924 = vrot.lane.b32.xlu1 %v921_v59, %s1075_s1 }
0x14d8   :  { %v925_v63 = vpop.permute.xlu1 %924 }
0x14d9   :  { %989 = vmatmul.msk.f32.vlgmr.msrb.gmra.mxu3 %vm79_vm0, %v925_v63 }
0x155c   :  { %v945_v0 = vpop.f32.mrf.mxu3 }
0x155d   :  { %v946_v5 = vadd.f32 %v945_v0, %v922_v1 }
0x155f   :  { %v948_v6 = vsel %vm879_vm15, %v946_v5, 0.0 }
0x1560   :  { %949 = vst [vmem:[%s1596_s3] sm:$0xff] %v948_v6 }

</bundles_post_ra>
